<compile_context>
chip_gen: v7x
topology: tpu7x:2x2x1
jax: 0.10.0
libtpu: 0.0.40
codegen_flags: <defaults>
</compile_context>

<pallas_src>
import functools

import jax
import jax.numpy as jnp
from jax.experimental import pallas as pl
from jax.experimental.pallas import tpu as pltpu

EPS = 1e-5  # PyTorch BatchNorm1d default eps

# ----------------------------------------------------------------------------
# Model configuration (small shapes consistent with the module)
# ----------------------------------------------------------------------------
LOCAL_FEATURES = (0, 1, 2, 3)      # n_local_feat = 4
GLOBAL_FEATURES = (4, 5, 6)        # n_global_feat = 3
USE_GLOBAL = True
CNN_ONE = 32
CNN_TWO = 32
K = 3
STRIDE = 2
PAD = 1
POOL = 2
RNN_H = 16                         # 2H=32, 8H=128 (lane-dense fused gate slab)
DENSE_ONE = 32
DENSE_TWO = 32

BATCH = 2
SEQ_LEN = 64                       # -> conv1 32 -> pool 16 -> conv2 8 -> pool 4 = T


def _vmem():
    return pl.BlockSpec(memory_space=pltpu.MemorySpace.VMEM)


# ----------------------------------------------------------------------------
# The single fused kernel
# ----------------------------------------------------------------------------
def net_fused_kernel(
    xsel_ref,        # (2*B*P1, K*CIN)  im2col rows for both MaxPool taps
    gf_ref,          # (B, NG)          global features
    pp_ref,          # (Prows, 32)      packed conv / pool-select / dense slab
    lp_ref,          # (3*(2D+2H+1), 8H) packed LSTM slab (3 layers)
    out_ref,         # (B, 1)
    act1_ref, act2_ref,                 # (T*B, 2H) inter-layer activations
    *, B, T, H, P1, CIN, C1, C2, NG, D1, D2,
):
    f32 = jnp.float32
    dot = functools.partial(jnp.dot, preferred_element_type=f32)
    H2, H6, H8 = 2 * H, 6 * H, 8 * H
    TB = T * B
    BP1 = B * P1

    # static row offsets into the packed 32-lane parameter slab -------------
    o = 0
    O_W1 = o; o += K * CIN
    O_B1 = o; o += 1
    O_BN1S = o; o += 1
    O_BN1T = o; o += 1
    O_W2 = o; o += K * C1
    O_B2 = o; o += 1
    O_F = o; o += 2 * TB
    O_D1H = o; o += H2
    O_D1G = o; o += NG
    O_D1B = o; o += 1
    O_D2 = o; o += D1
    O_D2B = o; o += 1
    O_D3 = o; o += D2
    O_D3B = o; o += 1

    # ---- conv block 1: single matmul on the im2col rows; the stride-2 conv
    #      + MaxPool2 are folded in by computing both pool taps and taking max.
    y1 = dot(xsel_ref[...], pp_ref[O_W1:O_W1 + K * CIN, :]) + pp_ref[O_B1:O_B1 + 1, :]
    y1 = jnp.maximum(y1, 0.0)                                   # ReLU
    p1 = jnp.maximum(y1[0:BP1, :], y1[BP1:2 * BP1, :])          # (B*P1, C1)

    # bn_cnn1 affine applied post-pool (kept out of the conv fold so that
    # conv2's zero padding stays exactly PyTorch's literal zeros)
    p1 = p1 * pp_ref[O_BN1S:O_BN1S + 1, :] + pp_ref[O_BN1T:O_BN1T + 1, :]

    # ---- conv block 2: taps via sublane roll + boundary mask (XLU) --------
    pos = jax.lax.broadcasted_iota(jnp.int32, (BP1, C1), 0) % P1
    tap0 = jnp.where(pos == 0, 0.0, pltpu.roll(p1, 1, axis=0))
    tap2 = jnp.where(pos == P1 - 1, 0.0, pltpu.roll(p1, BP1 - 1, axis=0))
    y2 = (dot(tap0, pp_ref[O_W2:O_W2 + C1, :])
          + dot(p1, pp_ref[O_W2 + C1:O_W2 + 2 * C1, :])
          + dot(tap2, pp_ref[O_W2 + 2 * C1:O_W2 + 3 * C1, :])
          + pp_ref[O_B2:O_B2 + 1, :])
    y2 = jnp.maximum(y2, 0.0)                                   # ReLU

    # stride-2 + MaxPool2 selection: one stacked matmul, max of the two
    # row-halves; output rows are time-major (t*B + b).
    sel = dot(pp_ref[O_F:O_F + 2 * TB, :], y2)                  # (2*T*B, C2)
    x_rnn = jnp.maximum(sel[0:TB, :], sel[TB:2 * TB, :])        # (T*B, C2)

    # ---- three bidirectional LSTM layers, fwd + bwd fused per serial step --
    # gate column layout (prep time): [i_f i_b | f_f f_b | o_f o_b | g_f g_b]
    # so sigmoid covers cols 0:6H and tanh covers 6H:8H, and each gate slice
    # (B, 2H) lines up with the [fwd|bwd] layout of h_cat / c_cat.
    def bilstm(x2d, base, y_scr):
        D = x2d.shape[1]
        wih_f = lp_ref[base:base + D, :]                        # fwd cols only
        wih_b = lp_ref[base + D:base + 2 * D, :]                # bwd cols only
        whh = lp_ref[base + 2 * D:base + 2 * D + H2, :]         # (2H, 8H)
        bias = lp_ref[base + 2 * D + H2:base + 2 * D + H2 + 1, :]
        # hoisted input projections (off the serial chain)
        gxf = dot(x2d, wih_f) + bias                            # (T*B, 8H)
        gxb = dot(x2d, wih_b)                                   # (T*B, 8H)

        h = jnp.zeros((B, H2), f32)                             # [h_f | h_b]
        c = jnp.zeros((B, H2), f32)
        for t in range(T):                                      # T small & static
            g = (gxf[t * B:(t + 1) * B, :]
                 + gxb[(T - 1 - t) * B:(T - t) * B, :]
                 + dot(h, whh))                                 # (B, 8H) one MXU push
            sg = jax.nn.sigmoid(g[:, 0:H6])                     # i|f|o, both dirs
            gg = jnp.tanh(g[:, H6:H8])                          # g, both dirs
            c = sg[:, H2:2 * H2] * c + sg[:, 0:H2] * gg
            h = sg[:, 2 * H2:3 * H2] * jnp.tanh(c)
            if y_scr is not None:
                y_scr[t * B:(t + 1) * B, 0:H] = h[:, 0:H]                 # fwd @ t
                y_scr[(T - 1 - t) * B:(T - t) * B, H:H2] = h[:, H:H2]     # bwd @ T-1-t
        return h                                                # [h_fwd(T-1) | h_bwd(0)]

    base1 = 0
    base2 = base1 + 2 * C2 + H2 + 1
    base3 = base2 + 3 * H2 + 1
    bilstm(x_rnn, base1, act1_ref)
    bilstm(act1_ref[...], base2, act2_ref)
    h_last = bilstm(act2_ref[...], base3, None)

    # ---- dense head (bn_dense folded into dense1) --------------------------
    z1 = (dot(h_last, pp_ref[O_D1H:O_D1H + H2, :])
          + dot(gf_ref[...], pp_ref[O_D1G:O_D1G + NG, :])
          + pp_ref[O_D1B:O_D1B + 1, :])
    z1 = jnp.maximum(z1, 0.0)
    z2 = jnp.maximum(dot(z1, pp_ref[O_D2:O_D2 + D1, :]) + pp_ref[O_D2B:O_D2B + 1, :], 0.0)
    z3 = dot(z2, pp_ref[O_D3:O_D3 + D2, :]) + pp_ref[O_D3B:O_D3B + 1, :]
    out_ref[...] = jax.nn.sigmoid(z3[:, 0:1])


# ----------------------------------------------------------------------------
# Parameter init (raw PyTorch-layout parameters)
# ----------------------------------------------------------------------------
def _kaiming_uniform(key, shape, fan_in):
    bound = jnp.sqrt(6.0 / fan_in)
    return jax.random.uniform(key, shape, jnp.float32, -bound, bound)


def _uniform(key, shape, bound):
    return jax.random.uniform(key, shape, jnp.float32, -bound, bound)


def _bn_params(n):
    # PyTorch defaults: weight=1, bias=0, running_mean=0, running_var=1
    return (jnp.ones((n,), jnp.float32), jnp.zeros((n,), jnp.float32),
            jnp.zeros((n,), jnp.float32), jnp.ones((n,), jnp.float32))


def _lstm_raw(key, d_in, hidden):
    ks = jax.random.split(key, 8)
    b = 1.0 / float(hidden) ** 0.5
    return (_uniform(ks[0], (4 * hidden, d_in), b), _uniform(ks[1], (4 * hidden, hidden), b),
            _uniform(ks[2], (4 * hidden,), b), _uniform(ks[3], (4 * hidden,), b),
            _uniform(ks[4], (4 * hidden, d_in), b), _uniform(ks[5], (4 * hidden, hidden), b),
            _uniform(ks[6], (4 * hidden,), b), _uniform(ks[7], (4 * hidden,), b))


def init_params(key):
    keys = jax.random.split(key, 16)
    n_local = len(LOCAL_FEATURES)
    n_global = len(GLOBAL_FEATURES)
    p = {}
    p["bn_start"] = _bn_params(n_local)
    p["conv1_w"] = _kaiming_uniform(keys[0], (CNN_ONE, n_local, K), n_local * K)
    p["conv1_b"] = _uniform(keys[1], (CNN_ONE,), 1.0 / (n_local * K) ** 0.5)
    p["bn_cnn1"] = _bn_params(CNN_ONE)
    p["conv2_w"] = _kaiming_uniform(keys[2], (CNN_TWO, CNN_ONE, K), CNN_ONE * K)
    p["conv2_b"] = _uniform(keys[3], (CNN_TWO,), 1.0 / (CNN_ONE * K) ** 0.5)
    p["bn_cnn2"] = _bn_params(CNN_TWO)
    p["rnn1"] = _lstm_raw(keys[4], CNN_TWO, RNN_H)
    p["rnn2"] = _lstm_raw(keys[5], 2 * RNN_H, RNN_H)
    p["rnn3"] = _lstm_raw(keys[6], 2 * RNN_H, RNN_H)
    feat = 2 * RNN_H + (n_global if USE_GLOBAL else 0)
    p["bn_dense"] = _bn_params(feat)
    p["dense1"] = (_kaiming_uniform(keys[7], (DENSE_ONE, feat), feat),
                   _uniform(keys[8], (DENSE_ONE,), 1.0 / feat ** 0.5))
    p["dense2"] = (_kaiming_uniform(keys[9], (DENSE_TWO, DENSE_ONE), DENSE_ONE),
                   _uniform(keys[10], (DENSE_TWO,), 1.0 / DENSE_ONE ** 0.5))
    p["dense3"] = (_kaiming_uniform(keys[11], (1, DENSE_TWO), DENSE_TWO),
                   _uniform(keys[12], (1,), 1.0 / DENSE_TWO ** 0.5))
    return p


# ----------------------------------------------------------------------------
# One-time parameter preparation: BN folding, fused-direction gate layout,
# stacked pool-selection matrix, and the two packed VMEM slabs.
# ----------------------------------------------------------------------------
def _bn_fold(bn):
    gamma, beta, mean, var = bn
    scale = gamma / jnp.sqrt(var + EPS)
    shift = beta - mean * scale
    return scale, shift


def _prep_lstm(raw, H, in_scale=None, in_shift=None):
    """Per-layer slab (2D + 2H + 1, 8H):
       rows [0,D)      wih_f  (fwd gate columns, zeros elsewhere)
       rows [D,2D)     wih_b  (bwd gate columns, zeros elsewhere)
       rows [2D,2D+2H) block-structured w_hh for h_cat = [h_f | h_b]
       last row        bias (b_ih + b_hh, both directions)
       gate column order: [i_f i_b | f_f f_b | o_f o_b | g_f g_b]."""
    wif, whf, bif, bhf, wib, whb, bib, bhb = raw

    def fold(w_ih, b):
        if in_shift is not None:                  # fold input BatchNorm (exact)
            b = b + w_ih @ in_shift
            w_ih = w_ih * in_scale[None, :]
        return w_ih, b

    wif, bf = fold(wif, bif + bhf)
    wib, bb = fold(wib, bib + bhb)
    D = wif.shape[1]
    order = (0, 1, 3, 2)                          # PyTorch (i,f,g,o) -> i,f,o,g
    zD = jnp.zeros((D, H), jnp.float32)
    zH = jnp.zeros((H, H), jnp.float32)
    wf_cols, wb_cols, hf_cols, hb_cols, b_cols = [], [], [], [], []
    for gidx in order:
        s = gidx * H
        wf_cols += [wif[s:s + H, :].T, zD]
        wb_cols += [zD, wib[s:s + H, :].T]
        hf_cols += [whf[s:s + H, :].T, zH]
        hb_cols += [zH, whb[s:s + H, :].T]
        b_cols += [bf[s:s + H], bb[s:s + H]]
    wih_f = jnp.concatenate(wf_cols, axis=1)                      # (D, 8H)
    wih_b = jnp.concatenate(wb_cols, axis=1)                      # (D, 8H)
    whh = jnp.concatenate([jnp.concatenate(hf_cols, axis=1),
                           jnp.concatenate(hb_cols, axis=1)], axis=0)   # (2H, 8H)
    bias = jnp.concatenate(b_cols).reshape(1, 8 * H)
    return jnp.concatenate([wih_f, wih_b, whh, bias], axis=0)


def _f_stack(B, P1, T):
    # rows [F0; F2]: output row t*B + b selects y2 row b*P1 + 4t (+2)
    r = jnp.arange(T * B)
    t = r // B
    b = r % B
    c = b * P1 + STRIDE * POOL * t
    F0 = jnp.zeros((T * B, B * P1), jnp.float32).at[r, c].set(1.0)
    F2 = jnp.zeros((T * B, B * P1), jnp.float32).at[r, c + STRIDE].set(1.0)
    return jnp.concatenate([F0, F2], axis=0)


def prepare_params(p, B, L):
    H = RNN_H
    P1 = ((L + 2 * PAD - K) // STRIDE + 1) // POOL
    T = ((P1 + 2 * PAD - K) // STRIDE + 1) // POOL

    # all 32-lane slab pieces must share one lane width
    assert CNN_ONE == CNN_TWO == DENSE_ONE == DENSE_TWO == B * P1 == 32

    # bn_start: applied in the wrapper before zero padding (exact)
    s0, t0 = _bn_fold(p["bn_start"])

    # conv1 (raw weights, reshaped to (K*CIN, C1) with rows k*CIN + c)
    w1, b1 = p["conv1_w"], p["conv1_b"]
    w1s = jnp.concatenate([w1[:, :, k].T for k in range(K)], axis=0)

    # bn_cnn1: applied in-kernel to the pooled conv1 output (exact w.r.t. pad)
    s1, t1 = _bn_fold(p["bn_cnn1"])

    # conv2 (raw weights, (K*C1, C2))
    w2, b2 = p["conv2_w"], p["conv2_b"]
    w2s = jnp.concatenate([w2[:, :, k].T for k in range(K)], axis=0)

    # stacked stride-2 + MaxPool selection matrix (time-major output rows)
    F_stack = _f_stack(B, P1, T)

    # LSTM layers (bn_cnn2 folded into layer-1 input projection, exact)
    s2, t2 = _bn_fold(p["bn_cnn2"])
    lstm_slab = jnp.concatenate([_prep_lstm(p["rnn1"], H, s2, t2),
                                 _prep_lstm(p["rnn2"], H),
                                 _prep_lstm(p["rnn3"], H)], axis=0)

    # dense head (bn_dense folded into dense1, exact)
    sd, td = _bn_fold(p["bn_dense"])
    w1d, b1d = p["dense1"]
    d1b = (b1d + w1d @ td).reshape(1, -1)
    w1dT = (w1d * sd[None, :]).T                                   # (feat, D1)
    d1h = w1dT[:2 * H, :]
    d1g = w1dT[2 * H:, :]
    w2d, b2d = p["dense2"]
    w3d, b3d = p["dense3"]
    d3p = jnp.zeros((DENSE_TWO, 32), jnp.float32).at[:, 0].set(w3d[0, :])
    d3bp = jnp.zeros((1, 32), jnp.float32).at[0, 0].set(b3d[0])

    pslab = jnp.concatenate([
        w1s, b1.reshape(1, -1),
        s1.reshape(1, -1), t1.reshape(1, -1),
        w2s, b2.reshape(1, -1),
        F_stack,
        d1h, d1g, d1b,
        w2d.T, b2d.reshape(1, -1),
        d3p, d3bp], axis=0)                                        # (230, 32)

    return (s0, t0), pslab, lstm_slab


# ----------------------------------------------------------------------------
# Forward pass: light wrapper preprocessing (fused by XLA) + one pallas_call
# ----------------------------------------------------------------------------
def net_forward(x, bn0, pslab, lslab):
    # x: (B, C_total, L), NCL like the PyTorch Conv1d input
    bn0_scale, bn0_shift = bn0
    B, _, L = x.shape
    n_local = len(LOCAL_FEATURES)
    n_global = len(GLOBAL_FEATURES)

    gfeat = x[:, GLOBAL_FEATURES, 0]                               # (B, NG)
    local = x[:, LOCAL_FEATURES, :]                                # (B, CIN, L)
    # bn_start BEFORE zero padding (matches PyTorch exactly)
    xbn = local * bn0_scale[None, :, None] + bn0_shift[None, :, None]
    xpad = jnp.pad(xbn, ((0, 0), (0, 0), (PAD, PAD)))              # (B, CIN, L+2)
    xt = jnp.transpose(xpad, (0, 2, 1))                            # (B, L+2, CIN)

    P1 = ((L + 2 * PAD - K) // STRIDE + 1) // POOL
    T = ((P1 + 2 * PAD - K) // STRIDE + 1) // POOL
    SP = STRIDE * POOL

    # im2col rows for exactly the conv1 positions the stride-2 conv + MaxPool
    # need (both pool taps j=0 and j=STRIDE); row order b*P1 + u per block.
    def im2col(j):
        taps = [xt[:, j + k: j + k + SP * (P1 - 1) + 1: SP, :] for k in range(K)]
        return jnp.concatenate(taps, axis=-1).reshape(B * P1, K * n_local)

    xsel = jnp.concatenate([im2col(0), im2col(STRIDE)], axis=0)    # (2*B*P1, K*CIN)

    kernel = functools.partial(
        net_fused_kernel, B=B, T=T, H=RNN_H, P1=P1, CIN=n_local,
        C1=CNN_ONE, C2=CNN_TWO, NG=n_global, D1=DENSE_ONE, D2=DENSE_TWO)

    return pl.pallas_call(
        kernel,
        out_shape=jax.ShapeDtypeStruct((B, 1), jnp.float32),
        in_specs=[_vmem()] * 4,
        out_specs=_vmem(),
        scratch_shapes=[pltpu.VMEM((T * B, 2 * RNN_H), jnp.float32),
                        pltpu.VMEM((T * B, 2 * RNN_H), jnp.float32)],
    )(xsel, gfeat, pslab, lslab)


# TODO(synk): dropout layers are identity (inference mode); BatchNorm uses fixed
#             running statistics (applied/folded), no stat updates.

if __name__ == "__main__":
    B, L = BATCH, SEQ_LEN
    C_TOTAL = len(LOCAL_FEATURES) + len(GLOBAL_FEATURES)
    key = jax.random.PRNGKey(0)
    k_param, k_x = jax.random.split(key)

    params = init_params(k_param)
    bn0, pslab, lslab = prepare_params(params, B, L)               # one-time prep
    x = jax.random.normal(k_x, (B, C_TOTAL, L), jnp.float32)

    fwd = jax.jit(net_forward)
    out = jax.block_until_ready(fwd(x, bn0, pslab, lslab))

    assert out.shape == (B, 1)
    assert bool(jnp.all(jnp.isfinite(out)))
    assert bool(jnp.all((out >= 0.0) & (out <= 1.0)))
    print("KERNEL_OK")
</pallas_src>

<mosaic_0001>
module attributes {stable_mosaic.version = 11 : i64} {
  func.func @net_fused_kernel(%arg0: memref<64x12xf32, #tpu.memory_space<vmem>>, %arg1: memref<2x3xf32, #tpu.memory_space<vmem>>, %arg2: memref<230x32xf32, #tpu.memory_space<vmem>>, %arg3: memref<291x128xf32, #tpu.memory_space<vmem>>, %arg4: memref<2x1xf32, #tpu.memory_space<vmem>>, %arg5: memref<8x32xf32, #tpu.memory_space<vmem>>, %arg6: memref<8x32xf32, #tpu.memory_space<vmem>>) attributes {dimension_semantics = [], scalar_prefetch = 0 : i64, scratch_operands = 2 : i64, tpu.core_type = #tpu.core_type<tc>} {
    %c0 = arith.constant 0 : index
    %c0_0 = arith.constant 0 : index
    %0 = vector.load %arg0[%c0, %c0_0] : memref<64x12xf32, #tpu.memory_space<vmem>>, vector<64x12xf32>
    %c0_1 = arith.constant 0 : index
    %c0_2 = arith.constant 0 : index
    %1 = vector.load %arg2[%c0_1, %c0_2] : memref<230x32xf32, #tpu.memory_space<vmem>>, vector<12x32xf32>
    %cst = arith.constant dense<0.000000e+00> : vector<64x32xf32>
    %2 = tpu.matmul %0, %1, %cst {dimension_numbers = #tpu.dot_dimension_numbers<[1], [0], [0], [1], [0, 0, 1, 1], [], []>} : vector<64x12xf32>, vector<12x32xf32>, vector<64x32xf32> -> vector<64x32xf32>
    %c12 = arith.constant 12 : index
    %c0_3 = arith.constant 0 : index
    %3 = vector.load %arg2[%c12, %c0_3] : memref<230x32xf32, #tpu.memory_space<vmem>>, vector<1x32xf32>
    %4 = vector.broadcast %3 : vector<1x32xf32> to vector<64x32xf32>
    %5 = arith.addf %2, %4 : vector<64x32xf32>
    %cst_4 = arith.constant 0.000000e+00 : f32
    %6 = vector.broadcast %cst_4 : f32 to vector<64x32xf32>
    %7 = arith.maximumf %5, %6 : vector<64x32xf32>
    %8 = vector.extract_strided_slice %7 {offsets = [0, 0], sizes = [32, 32], strides = [1, 1]} : vector<64x32xf32> to vector<32x32xf32>
    %9 = vector.extract_strided_slice %7 {offsets = [32, 0], sizes = [32, 32], strides = [1, 1]} : vector<64x32xf32> to vector<32x32xf32>
    %10 = arith.maximumf %8, %9 : vector<32x32xf32>
    %c13 = arith.constant 13 : index
    %c0_5 = arith.constant 0 : index
    %11 = vector.load %arg2[%c13, %c0_5] : memref<230x32xf32, #tpu.memory_space<vmem>>, vector<1x32xf32>
    %12 = vector.broadcast %11 : vector<1x32xf32> to vector<32x32xf32>
    %13 = arith.mulf %10, %12 : vector<32x32xf32>
    %c14 = arith.constant 14 : index
    %c0_6 = arith.constant 0 : index
    %14 = vector.load %arg2[%c14, %c0_6] : memref<230x32xf32, #tpu.memory_space<vmem>>, vector<1x32xf32>
    %15 = vector.broadcast %14 : vector<1x32xf32> to vector<32x32xf32>
    %16 = arith.addf %13, %15 : vector<32x32xf32>
    %17 = tpu.iota {dimensions = array<i32: 0>} : vector<32x32xi32>
    %c16_i32 = arith.constant 16 : i32
    %c0_i32 = arith.constant 0 : i32
    %18 = arith.cmpi eq, %c16_i32, %c0_i32 : i32
    %c1_i32 = arith.constant 1 : i32
    %19 = arith.select %18, %c1_i32, %c16_i32 : i32
    %20 = vector.broadcast %19 : i32 to vector<32x32xi32>
    %21 = arith.remsi %17, %20 : vector<32x32xi32>
    %c0_i32_7 = arith.constant 0 : i32
    %22 = vector.broadcast %c0_i32_7 : i32 to vector<32x32xi32>
    %23 = arith.cmpi ne, %21, %22 : vector<32x32xi32>
    %c0_i32_8 = arith.constant 0 : i32
    %24 = vector.broadcast %c0_i32_8 : i32 to vector<32x32xi32>
    %25 = arith.cmpi slt, %21, %24 : vector<32x32xi32>
    %c0_i32_9 = arith.constant 0 : i32
    %26 = arith.cmpi slt, %19, %c0_i32_9 : i32
    %27 = vector.broadcast %26 : i1 to vector<32x32xi1>
    %28 = vector.broadcast %27 : vector<32x32xi1> to vector<32x32xi1>
    %29 = arith.xori %25, %28 : vector<32x32xi1>
    %30 = arith.andi %29, %23 : vector<32x32xi1>
    %31 = vector.broadcast %19 : i32 to vector<32x32xi32>
    %32 = arith.addi %21, %31 : vector<32x32xi32>
    %33 = arith.select %30, %32, %21 : vector<32x32xi1>, vector<32x32xi32>
    %c0_i32_10 = arith.constant 0 : i32
    %34 = vector.broadcast %c0_i32_10 : i32 to vector<32x32xi32>
    %35 = arith.cmpi eq, %33, %34 : vector<32x32xi32>
    %c1_i32_11 = arith.constant 1 : i32
    %36 = tpu.dynamic_rotate %16 by %c1_i32_11 dim 0 : vector<32x32xf32>, i32 -> vector<32x32xf32>
    %cst_12 = arith.constant 0.000000e+00 : f32
    %37 = vector.broadcast %cst_12 : f32 to vector<32x32xf32>
    %38 = arith.select %35, %37, %36 : vector<32x32xi1>, vector<32x32xf32>
    %c15_i32 = arith.constant 15 : i32
    %39 = vector.broadcast %c15_i32 : i32 to vector<32x32xi32>
    %40 = arith.cmpi eq, %33, %39 : vector<32x32xi32>
    %c31_i32 = arith.constant 31 : i32
    %41 = tpu.dynamic_rotate %16 by %c31_i32 dim 0 : vector<32x32xf32>, i32 -> vector<32x32xf32>
    %cst_13 = arith.constant 0.000000e+00 : f32
    %42 = vector.broadcast %cst_13 : f32 to vector<32x32xf32>
    %43 = arith.select %40, %42, %41 : vector<32x32xi1>, vector<32x32xf32>
    %c15 = arith.constant 15 : index
    %c0_14 = arith.constant 0 : index
    %44 = vector.load %arg2[%c15, %c0_14] : memref<230x32xf32, #tpu.memory_space<vmem>>, vector<32x32xf32>
    %cst_15 = arith.constant dense<0.000000e+00> : vector<32x32xf32>
    %45 = tpu.matmul %38, %44, %cst_15 {dimension_numbers = #tpu.dot_dimension_numbers<[1], [0], [0], [1], [0, 0, 1, 1], [], []>} : vector<32x32xf32>, vector<32x32xf32>, vector<32x32xf32> -> vector<32x32xf32>
    %c47 = arith.constant 47 : index
    %c0_16 = arith.constant 0 : index
    %46 = vector.load %arg2[%c47, %c0_16] : memref<230x32xf32, #tpu.memory_space<vmem>>, vector<32x32xf32>
    %cst_17 = arith.constant dense<0.000000e+00> : vector<32x32xf32>
    %47 = tpu.matmul %16, %46, %cst_17 {dimension_numbers = #tpu.dot_dimension_numbers<[1], [0], [0], [1], [0, 0, 1, 1], [], []>} : vector<32x32xf32>, vector<32x32xf32>, vector<32x32xf32> -> vector<32x32xf32>
    %48 = arith.addf %45, %47 : vector<32x32xf32>
    %c79 = arith.constant 79 : index
    %c0_18 = arith.constant 0 : index
    %49 = vector.load %arg2[%c79, %c0_18] : memref<230x32xf32, #tpu.memory_space<vmem>>, vector<32x32xf32>
    %cst_19 = arith.constant dense<0.000000e+00> : vector<32x32xf32>
    %50 = tpu.matmul %43, %49, %cst_19 {dimension_numbers = #tpu.dot_dimension_numbers<[1], [0], [0], [1], [0, 0, 1, 1], [], []>} : vector<32x32xf32>, vector<32x32xf32>, vector<32x32xf32> -> vector<32x32xf32>
    %51 = arith.addf %48, %50 : vector<32x32xf32>
    %c111 = arith.constant 111 : index
    %c0_20 = arith.constant 0 : index
    %52 = vector.load %arg2[%c111, %c0_20] : memref<230x32xf32, #tpu.memory_space<vmem>>, vector<1x32xf32>
    %53 = vector.broadcast %52 : vector<1x32xf32> to vector<32x32xf32>
    %54 = arith.addf %51, %53 : vector<32x32xf32>
    %cst_21 = arith.constant 0.000000e+00 : f32
    %55 = vector.broadcast %cst_21 : f32 to vector<32x32xf32>
    %56 = arith.maximumf %54, %55 : vector<32x32xf32>
    %c112 = arith.constant 112 : index
    %c0_22 = arith.constant 0 : index
    %57 = vector.load %arg2[%c112, %c0_22] : memref<230x32xf32, #tpu.memory_space<vmem>>, vector<16x32xf32>
    %cst_23 = arith.constant dense<0.000000e+00> : vector<16x32xf32>
    %58 = tpu.matmul %57, %56, %cst_23 {dimension_numbers = #tpu.dot_dimension_numbers<[1], [0], [0], [1], [0, 0, 1, 1], [], []>} : vector<16x32xf32>, vector<32x32xf32>, vector<16x32xf32> -> vector<16x32xf32>
    %59 = vector.extract_strided_slice %58 {offsets = [0, 0], sizes = [8, 32], strides = [1, 1]} : vector<16x32xf32> to vector<8x32xf32>
    %60 = vector.extract_strided_slice %58 {offsets = [8, 0], sizes = [8, 32], strides = [1, 1]} : vector<16x32xf32> to vector<8x32xf32>
    %61 = arith.maximumf %59, %60 : vector<8x32xf32>
    %c0_24 = arith.constant 0 : index
    %c0_25 = arith.constant 0 : index
    %62 = vector.load %arg3[%c0_24, %c0_25] : memref<291x128xf32, #tpu.memory_space<vmem>>, vector<32x128xf32>
    %c32 = arith.constant 32 : index
    %c0_26 = arith.constant 0 : index
    %63 = vector.load %arg3[%c32, %c0_26] : memref<291x128xf32, #tpu.memory_space<vmem>>, vector<32x128xf32>
    %c64 = arith.constant 64 : index
    %c0_27 = arith.constant 0 : index
    %64 = vector.load %arg3[%c64, %c0_27] : memref<291x128xf32, #tpu.memory_space<vmem>>, vector<32x128xf32>
    %c96 = arith.constant 96 : index
    %c0_28 = arith.constant 0 : index
    %65 = vector.load %arg3[%c96, %c0_28] : memref<291x128xf32, #tpu.memory_space<vmem>>, vector<1x128xf32>
    %cst_29 = arith.constant dense<0.000000e+00> : vector<8x128xf32>
    %66 = tpu.matmul %61, %62, %cst_29 {dimension_numbers = #tpu.dot_dimension_numbers<[1], [0], [0], [1], [0, 0, 1, 1], [], []>} : vector<8x32xf32>, vector<32x128xf32>, vector<8x128xf32> -> vector<8x128xf32>
    %67 = vector.broadcast %65 : vector<1x128xf32> to vector<8x128xf32>
    %68 = arith.addf %66, %67 : vector<8x128xf32>
    %cst_30 = arith.constant dense<0.000000e+00> : vector<8x128xf32>
    %69 = tpu.matmul %61, %63, %cst_30 {dimension_numbers = #tpu.dot_dimension_numbers<[1], [0], [0], [1], [0, 0, 1, 1], [], []>} : vector<8x32xf32>, vector<32x128xf32>, vector<8x128xf32> -> vector<8x128xf32>
    %cst_31 = arith.constant 0.000000e+00 : f32
    %70 = vector.broadcast %cst_31 : f32 to vector<2x32xf32>
    %cst_32 = arith.constant 0.000000e+00 : f32
    %71 = vector.broadcast %cst_32 : f32 to vector<2x32xf32>
    %72 = vector.extract_strided_slice %68 {offsets = [0, 0], sizes = [2, 128], strides = [1, 1]} : vector<8x128xf32> to vector<2x128xf32>
    %73 = vector.extract_strided_slice %69 {offsets = [6, 0], sizes = [2, 128], strides = [1, 1]} : vector<8x128xf32> to vector<2x128xf32>
    %74 = arith.addf %72, %73 : vector<2x128xf32>
    %cst_33 = arith.constant dense<0.000000e+00> : vector<2x128xf32>
    %75 = tpu.matmul %70, %64, %cst_33 {dimension_numbers = #tpu.dot_dimension_numbers<[1], [0], [0], [1], [0, 0, 1, 1], [], []>} : vector<2x32xf32>, vector<32x128xf32>, vector<2x128xf32> -> vector<2x128xf32>
    %76 = arith.addf %74, %75 : vector<2x128xf32>
    %77 = vector.extract_strided_slice %76 {offsets = [0, 0], sizes = [2, 96], strides = [1, 1]} : vector<2x128xf32> to vector<2x96xf32>
    %78 = arith.negf %77 : vector<2x96xf32>
    %79 = math.exp %78 : vector<2x96xf32>
    %cst_34 = arith.constant 1.000000e+00 : f32
    %80 = vector.broadcast %cst_34 : f32 to vector<2x96xf32>
    %81 = arith.addf %80, %79 : vector<2x96xf32>
    %82 = arith.divf %80, %81 : vector<2x96xf32>
    %83 = vector.extract_strided_slice %76 {offsets = [0, 96], sizes = [2, 32], strides = [1, 1]} : vector<2x128xf32> to vector<2x32xf32>
    %84 = math.tanh %83 : vector<2x32xf32>
    %85 = vector.extract_strided_slice %82 {offsets = [0, 32], sizes = [2, 32], strides = [1, 1]} : vector<2x96xf32> to vector<2x32xf32>
    %86 = arith.mulf %85, %71 : vector<2x32xf32>
    %87 = vector.extract_strided_slice %82 {offsets = [0, 0], sizes = [2, 32], strides = [1, 1]} : vector<2x96xf32> to vector<2x32xf32>
    %88 = arith.mulf %87, %84 : vector<2x32xf32>
    %89 = arith.addf %86, %88 : vector<2x32xf32>
    %90 = vector.extract_strided_slice %82 {offsets = [0, 64], sizes = [2, 32], strides = [1, 1]} : vector<2x96xf32> to vector<2x32xf32>
    %91 = math.tanh %89 : vector<2x32xf32>
    %92 = arith.mulf %90, %91 : vector<2x32xf32>
    %93 = vector.extract_strided_slice %92 {offsets = [0, 0], sizes = [2, 16], strides = [1, 1]} : vector<2x32xf32> to vector<2x16xf32>
    %c0_35 = arith.constant 0 : index
    %c0_36 = arith.constant 0 : index
    %94 = vector.load %arg5[%c0_35, %c0_36] : memref<8x32xf32, #tpu.memory_space<vmem>>, vector<2x16xf32>
    tpu.vector_store %arg5[%c0_35, %c0_36], %93 {strides = array<i32>} : memref<8x32xf32, #tpu.memory_space<vmem>>, vector<2x16xf32>,
    %95 = vector.extract_strided_slice %92 {offsets = [0, 16], sizes = [2, 16], strides = [1, 1]} : vector<2x32xf32> to vector<2x16xf32>
    %c6 = arith.constant 6 : index
    %c16 = arith.constant 16 : index
    %96 = vector.load %arg5[%c6, %c16] : memref<8x32xf32, #tpu.memory_space<vmem>>, vector<2x16xf32>
    tpu.vector_store %arg5[%c6, %c16], %95 {strides = array<i32>} : memref<8x32xf32, #tpu.memory_space<vmem>>, vector<2x16xf32>,
    %97 = vector.extract_strided_slice %68 {offsets = [2, 0], sizes = [2, 128], strides = [1, 1]} : vector<8x128xf32> to vector<2x128xf32>
    %98 = vector.extract_strided_slice %69 {offsets = [4, 0], sizes = [2, 128], strides = [1, 1]} : vector<8x128xf32> to vector<2x128xf32>
    %99 = arith.addf %97, %98 : vector<2x128xf32>
    %cst_37 = arith.constant dense<0.000000e+00> : vector<2x128xf32>
    %100 = tpu.matmul %92, %64, %cst_37 {dimension_numbers = #tpu.dot_dimension_numbers<[1], [0], [0], [1], [0, 0, 1, 1], [], []>} : vector<2x32xf32>, vector<32x128xf32>, vector<2x128xf32> -> vector<2x128xf32>
    %101 = arith.addf %99, %100 : vector<2x128xf32>
    %102 = vector.extract_strided_slice %101 {offsets = [0, 0], sizes = [2, 96], strides = [1, 1]} : vector<2x128xf32> to vector<2x96xf32>
    %103 = arith.negf %102 : vector<2x96xf32>
    %104 = math.exp %103 : vector<2x96xf32>
    %cst_38 = arith.constant 1.000000e+00 : f32
    %105 = vector.broadcast %cst_38 : f32 to vector<2x96xf32>
    %106 = arith.addf %105, %104 : vector<2x96xf32>
    %107 = arith.divf %105, %106 : vector<2x96xf32>
    %108 = vector.extract_strided_slice %101 {offsets = [0, 96], sizes = [2, 32], strides = [1, 1]} : vector<2x128xf32> to vector<2x32xf32>
    %109 = math.tanh %108 : vector<2x32xf32>
    %110 = vector.extract_strided_slice %107 {offsets = [0, 32], sizes = [2, 32], strides = [1, 1]} : vector<2x96xf32> to vector<2x32xf32>
    %111 = arith.mulf %110, %89 : vector<2x32xf32>
    %112 = vector.extract_strided_slice %107 {offsets = [0, 0], sizes = [2, 32], strides = [1, 1]} : vector<2x96xf32> to vector<2x32xf32>
    %113 = arith.mulf %112, %109 : vector<2x32xf32>
    %114 = arith.addf %111, %113 : vector<2x32xf32>
    %115 = vector.extract_strided_slice %107 {offsets = [0, 64], sizes = [2, 32], strides = [1, 1]} : vector<2x96xf32> to vector<2x32xf32>
    %116 = math.tanh %114 : vector<2x32xf32>
    %117 = arith.mulf %115, %116 : vector<2x32xf32>
    %118 = vector.extract_strided_slice %117 {offsets = [0, 0], sizes = [2, 16], strides = [1, 1]} : vector<2x32xf32> to vector<2x16xf32>
    %c2 = arith.constant 2 : index
    %c0_39 = arith.constant 0 : index
    %119 = vector.load %arg5[%c2, %c0_39] : memref<8x32xf32, #tpu.memory_space<vmem>>, vector<2x16xf32>
    tpu.vector_store %arg5[%c2, %c0_39], %118 {strides = array<i32>} : memref<8x32xf32, #tpu.memory_space<vmem>>, vector<2x16xf32>,
    %120 = vector.extract_strided_slice %117 {offsets = [0, 16], sizes = [2, 16], strides = [1, 1]} : vector<2x32xf32> to vector<2x16xf32>
    %c4 = arith.constant 4 : index
    %c16_40 = arith.constant 16 : index
    %121 = vector.load %arg5[%c4, %c16_40] : memref<8x32xf32, #tpu.memory_space<vmem>>, vector<2x16xf32>
    tpu.vector_store %arg5[%c4, %c16_40], %120 {strides = array<i32>} : memref<8x32xf32, #tpu.memory_space<vmem>>, vector<2x16xf32>,
    %122 = vector.extract_strided_slice %68 {offsets = [4, 0], sizes = [2, 128], strides = [1, 1]} : vector<8x128xf32> to vector<2x128xf32>
    %123 = vector.extract_strided_slice %69 {offsets = [2, 0], sizes = [2, 128], strides = [1, 1]} : vector<8x128xf32> to vector<2x128xf32>
    %124 = arith.addf %122, %123 : vector<2x128xf32>
    %cst_41 = arith.constant dense<0.000000e+00> : vector<2x128xf32>
    %125 = tpu.matmul %117, %64, %cst_41 {dimension_numbers = #tpu.dot_dimension_numbers<[1], [0], [0], [1], [0, 0, 1, 1], [], []>} : vector<2x32xf32>, vector<32x128xf32>, vector<2x128xf32> -> vector<2x128xf32>
    %126 = arith.addf %124, %125 : vector<2x128xf32>
    %127 = vector.extract_strided_slice %126 {offsets = [0, 0], sizes = [2, 96], strides = [1, 1]} : vector<2x128xf32> to vector<2x96xf32>
    %128 = arith.negf %127 : vector<2x96xf32>
    %129 = math.exp %128 : vector<2x96xf32>
    %cst_42 = arith.constant 1.000000e+00 : f32
    %130 = vector.broadcast %cst_42 : f32 to vector<2x96xf32>
    %131 = arith.addf %130, %129 : vector<2x96xf32>
    %132 = arith.divf %130, %131 : vector<2x96xf32>
    %133 = vector.extract_strided_slice %126 {offsets = [0, 96], sizes = [2, 32], strides = [1, 1]} : vector<2x128xf32> to vector<2x32xf32>
    %134 = math.tanh %133 : vector<2x32xf32>
    %135 = vector.extract_strided_slice %132 {offsets = [0, 32], sizes = [2, 32], strides = [1, 1]} : vector<2x96xf32> to vector<2x32xf32>
    %136 = arith.mulf %135, %114 : vector<2x32xf32>
    %137 = vector.extract_strided_slice %132 {offsets = [0, 0], sizes = [2, 32], strides = [1, 1]} : vector<2x96xf32> to vector<2x32xf32>
    %138 = arith.mulf %137, %134 : vector<2x32xf32>
    %139 = arith.addf %136, %138 : vector<2x32xf32>
    %140 = vector.extract_strided_slice %132 {offsets = [0, 64], sizes = [2, 32], strides = [1, 1]} : vector<2x96xf32> to vector<2x32xf32>
    %141 = math.tanh %139 : vector<2x32xf32>
    %142 = arith.mulf %140, %141 : vector<2x32xf32>
    %143 = vector.extract_strided_slice %142 {offsets = [0, 0], sizes = [2, 16], strides = [1, 1]} : vector<2x32xf32> to vector<2x16xf32>
    %c4_43 = arith.constant 4 : index
    %c0_44 = arith.constant 0 : index
    %144 = vector.load %arg5[%c4_43, %c0_44] : memref<8x32xf32, #tpu.memory_space<vmem>>, vector<2x16xf32>
    tpu.vector_store %arg5[%c4_43, %c0_44], %143 {strides = array<i32>} : memref<8x32xf32, #tpu.memory_space<vmem>>, vector<2x16xf32>,
    %145 = vector.extract_strided_slice %142 {offsets = [0, 16], sizes = [2, 16], strides = [1, 1]} : vector<2x32xf32> to vector<2x16xf32>
    %c2_45 = arith.constant 2 : index
    %c16_46 = arith.constant 16 : index
    %146 = vector.load %arg5[%c2_45, %c16_46] : memref<8x32xf32, #tpu.memory_space<vmem>>, vector<2x16xf32>
    tpu.vector_store %arg5[%c2_45, %c16_46], %145 {strides = array<i32>} : memref<8x32xf32, #tpu.memory_space<vmem>>, vector<2x16xf32>,
    %147 = vector.extract_strided_slice %68 {offsets = [6, 0], sizes = [2, 128], strides = [1, 1]} : vector<8x128xf32> to vector<2x128xf32>
    %148 = vector.extract_strided_slice %69 {offsets = [0, 0], sizes = [2, 128], strides = [1, 1]} : vector<8x128xf32> to vector<2x128xf32>
    %149 = arith.addf %147, %148 : vector<2x128xf32>
    %cst_47 = arith.constant dense<0.000000e+00> : vector<2x128xf32>
    %150 = tpu.matmul %142, %64, %cst_47 {dimension_numbers = #tpu.dot_dimension_numbers<[1], [0], [0], [1], [0, 0, 1, 1], [], []>} : vector<2x32xf32>, vector<32x128xf32>, vector<2x128xf32> -> vector<2x128xf32>
    %151 = arith.addf %149, %150 : vector<2x128xf32>
    %152 = vector.extract_strided_slice %151 {offsets = [0, 0], sizes = [2, 96], strides = [1, 1]} : vector<2x128xf32> to vector<2x96xf32>
    %153 = arith.negf %152 : vector<2x96xf32>
    %154 = math.exp %153 : vector<2x96xf32>
    %cst_48 = arith.constant 1.000000e+00 : f32
    %155 = vector.broadcast %cst_48 : f32 to vector<2x96xf32>
    %156 = arith.addf %155, %154 : vector<2x96xf32>
    %157 = arith.divf %155, %156 : vector<2x96xf32>
    %158 = vector.extract_strided_slice %151 {offsets = [0, 96], sizes = [2, 32], strides = [1, 1]} : vector<2x128xf32> to vector<2x32xf32>
    %159 = math.tanh %158 : vector<2x32xf32>
    %160 = vector.extract_strided_slice %157 {offsets = [0, 32], sizes = [2, 32], strides = [1, 1]} : vector<2x96xf32> to vector<2x32xf32>
    %161 = arith.mulf %160, %139 : vector<2x32xf32>
    %162 = vector.extract_strided_slice %157 {offsets = [0, 0], sizes = [2, 32], strides = [1, 1]} : vector<2x96xf32> to vector<2x32xf32>
    %163 = arith.mulf %162, %159 : vector<2x32xf32>
    %164 = arith.addf %161, %163 : vector<2x32xf32>
    %165 = vector.extract_strided_slice %157 {offsets = [0, 64], sizes = [2, 32], strides = [1, 1]} : vector<2x96xf32> to vector<2x32xf32>
    %166 = math.tanh %164 : vector<2x32xf32>
    %167 = arith.mulf %165, %166 : vector<2x32xf32>
    %168 = vector.extract_strided_slice %167 {offsets = [0, 0], sizes = [2, 16], strides = [1, 1]} : vector<2x32xf32> to vector<2x16xf32>
    %c6_49 = arith.constant 6 : index
    %c0_50 = arith.constant 0 : index
    %169 = vector.load %arg5[%c6_49, %c0_50] : memref<8x32xf32, #tpu.memory_space<vmem>>, vector<2x16xf32>
    tpu.vector_store %arg5[%c6_49, %c0_50], %168 {strides = array<i32>} : memref<8x32xf32, #tpu.memory_space<vmem>>, vector<2x16xf32>,
    %170 = vector.extract_strided_slice %167 {offsets = [0, 16], sizes = [2, 16], strides = [1, 1]} : vector<2x32xf32> to vector<2x16xf32>
    %c0_51 = arith.constant 0 : index
    %c16_52 = arith.constant 16 : index
    %171 = vector.load %arg5[%c0_51, %c16_52] : memref<8x32xf32, #tpu.memory_space<vmem>>, vector<2x16xf32>
    tpu.vector_store %arg5[%c0_51, %c16_52], %170 {strides = array<i32>} : memref<8x32xf32, #tpu.memory_space<vmem>>, vector<2x16xf32>,
    %c0_53 = arith.constant 0 : index
    %c0_54 = arith.constant 0 : index
    %172 = vector.load %arg5[%c0_53, %c0_54] : memref<8x32xf32, #tpu.memory_space<vmem>>, vector<8x32xf32>
    %c97 = arith.constant 97 : index
    %c0_55 = arith.constant 0 : index
    %173 = vector.load %arg3[%c97, %c0_55] : memref<291x128xf32, #tpu.memory_space<vmem>>, vector<32x128xf32>
    %c129 = arith.constant 129 : index
    %c0_56 = arith.constant 0 : index
    %174 = vector.load %arg3[%c129, %c0_56] : memref<291x128xf32, #tpu.memory_space<vmem>>, vector<32x128xf32>
    %c161 = arith.constant 161 : index
    %c0_57 = arith.constant 0 : index
    %175 = vector.load %arg3[%c161, %c0_57] : memref<291x128xf32, #tpu.memory_space<vmem>>, vector<32x128xf32>
    %c193 = arith.constant 193 : index
    %c0_58 = arith.constant 0 : index
    %176 = vector.load %arg3[%c193, %c0_58] : memref<291x128xf32, #tpu.memory_space<vmem>>, vector<1x128xf32>
    %cst_59 = arith.constant dense<0.000000e+00> : vector<8x128xf32>
    %177 = tpu.matmul %172, %173, %cst_59 {dimension_numbers = #tpu.dot_dimension_numbers<[1], [0], [0], [1], [0, 0, 1, 1], [], []>} : vector<8x32xf32>, vector<32x128xf32>, vector<8x128xf32> -> vector<8x128xf32>
    %178 = vector.broadcast %176 : vector<1x128xf32> to vector<8x128xf32>
    %179 = arith.addf %177, %178 : vector<8x128xf32>
    %cst_60 = arith.constant dense<0.000000e+00> : vector<8x128xf32>
    %180 = tpu.matmul %172, %174, %cst_60 {dimension_numbers = #tpu.dot_dimension_numbers<[1], [0], [0], [1], [0, 0, 1, 1], [], []>} : vector<8x32xf32>, vector<32x128xf32>, vector<8x128xf32> -> vector<8x128xf32>
    %cst_61 = arith.constant 0.000000e+00 : f32
    %181 = vector.broadcast %cst_61 : f32 to vector<2x32xf32>
    %cst_62 = arith.constant 0.000000e+00 : f32
    %182 = vector.broadcast %cst_62 : f32 to vector<2x32xf32>
    %183 = vector.extract_strided_slice %179 {offsets = [0, 0], sizes = [2, 128], strides = [1, 1]} : vector<8x128xf32> to vector<2x128xf32>
    %184 = vector.extract_strided_slice %180 {offsets = [6, 0], sizes = [2, 128], strides = [1, 1]} : vector<8x128xf32> to vector<2x128xf32>
    %185 = arith.addf %183, %184 : vector<2x128xf32>
    %cst_63 = arith.constant dense<0.000000e+00> : vector<2x128xf32>
    %186 = tpu.matmul %181, %175, %cst_63 {dimension_numbers = #tpu.dot_dimension_numbers<[1], [0], [0], [1], [0, 0, 1, 1], [], []>} : vector<2x32xf32>, vector<32x128xf32>, vector<2x128xf32> -> vector<2x128xf32>
    %187 = arith.addf %185, %186 : vector<2x128xf32>
    %188 = vector.extract_strided_slice %187 {offsets = [0, 0], sizes = [2, 96], strides = [1, 1]} : vector<2x128xf32> to vector<2x96xf32>
    %189 = arith.negf %188 : vector<2x96xf32>
    %190 = math.exp %189 : vector<2x96xf32>
    %cst_64 = arith.constant 1.000000e+00 : f32
    %191 = vector.broadcast %cst_64 : f32 to vector<2x96xf32>
    %192 = arith.addf %191, %190 : vector<2x96xf32>
    %193 = arith.divf %191, %192 : vector<2x96xf32>
    %194 = vector.extract_strided_slice %187 {offsets = [0, 96], sizes = [2, 32], strides = [1, 1]} : vector<2x128xf32> to vector<2x32xf32>
    %195 = math.tanh %194 : vector<2x32xf32>
    %196 = vector.extract_strided_slice %193 {offsets = [0, 32], sizes = [2, 32], strides = [1, 1]} : vector<2x96xf32> to vector<2x32xf32>
    %197 = arith.mulf %196, %182 : vector<2x32xf32>
    %198 = vector.extract_strided_slice %193 {offsets = [0, 0], sizes = [2, 32], strides = [1, 1]} : vector<2x96xf32> to vector<2x32xf32>
    %199 = arith.mulf %198, %195 : vector<2x32xf32>
    %200 = arith.addf %197, %199 : vector<2x32xf32>
    %201 = vector.extract_strided_slice %193 {offsets = [0, 64], sizes = [2, 32], strides = [1, 1]} : vector<2x96xf32> to vector<2x32xf32>
    %202 = math.tanh %200 : vector<2x32xf32>
    %203 = arith.mulf %201, %202 : vector<2x32xf32>
    %204 = vector.extract_strided_slice %203 {offsets = [0, 0], sizes = [2, 16], strides = [1, 1]} : vector<2x32xf32> to vector<2x16xf32>
    %c0_65 = arith.constant 0 : index
    %c0_66 = arith.constant 0 : index
    %205 = vector.load %arg6[%c0_65, %c0_66] : memref<8x32xf32, #tpu.memory_space<vmem>>, vector<2x16xf32>
    tpu.vector_store %arg6[%c0_65, %c0_66], %204 {strides = array<i32>} : memref<8x32xf32, #tpu.memory_space<vmem>>, vector<2x16xf32>,
    %206 = vector.extract_strided_slice %203 {offsets = [0, 16], sizes = [2, 16], strides = [1, 1]} : vector<2x32xf32> to vector<2x16xf32>
    %c6_67 = arith.constant 6 : index
    %c16_68 = arith.constant 16 : index
    %207 = vector.load %arg6[%c6_67, %c16_68] : memref<8x32xf32, #tpu.memory_space<vmem>>, vector<2x16xf32>
    tpu.vector_store %arg6[%c6_67, %c16_68], %206 {strides = array<i32>} : memref<8x32xf32, #tpu.memory_space<vmem>>, vector<2x16xf32>,
    %208 = vector.extract_strided_slice %179 {offsets = [2, 0], sizes = [2, 128], strides = [1, 1]} : vector<8x128xf32> to vector<2x128xf32>
    %209 = vector.extract_strided_slice %180 {offsets = [4, 0], sizes = [2, 128], strides = [1, 1]} : vector<8x128xf32> to vector<2x128xf32>
    %210 = arith.addf %208, %209 : vector<2x128xf32>
    %cst_69 = arith.constant dense<0.000000e+00> : vector<2x128xf32>
    %211 = tpu.matmul %203, %175, %cst_69 {dimension_numbers = #tpu.dot_dimension_numbers<[1], [0], [0], [1], [0, 0, 1, 1], [], []>} : vector<2x32xf32>, vector<32x128xf32>, vector<2x128xf32> -> vector<2x128xf32>
    %212 = arith.addf %210, %211 : vector<2x128xf32>
    %213 = vector.extract_strided_slice %212 {offsets = [0, 0], sizes = [2, 96], strides = [1, 1]} : vector<2x128xf32> to vector<2x96xf32>
    %214 = arith.negf %213 : vector<2x96xf32>
    %215 = math.exp %214 : vector<2x96xf32>
    %cst_70 = arith.constant 1.000000e+00 : f32
    %216 = vector.broadcast %cst_70 : f32 to vector<2x96xf32>
    %217 = arith.addf %216, %215 : vector<2x96xf32>
    %218 = arith.divf %216, %217 : vector<2x96xf32>
    %219 = vector.extract_strided_slice %212 {offsets = [0, 96], sizes = [2, 32], strides = [1, 1]} : vector<2x128xf32> to vector<2x32xf32>
    %220 = math.tanh %219 : vector<2x32xf32>
    %221 = vector.extract_strided_slice %218 {offsets = [0, 32], sizes = [2, 32], strides = [1, 1]} : vector<2x96xf32> to vector<2x32xf32>
    %222 = arith.mulf %221, %200 : vector<2x32xf32>
    %223 = vector.extract_strided_slice %218 {offsets = [0, 0], sizes = [2, 32], strides = [1, 1]} : vector<2x96xf32> to vector<2x32xf32>
    %224 = arith.mulf %223, %220 : vector<2x32xf32>
    %225 = arith.addf %222, %224 : vector<2x32xf32>
    %226 = vector.extract_strided_slice %218 {offsets = [0, 64], sizes = [2, 32], strides = [1, 1]} : vector<2x96xf32> to vector<2x32xf32>
    %227 = math.tanh %225 : vector<2x32xf32>
    %228 = arith.mulf %226, %227 : vector<2x32xf32>
    %229 = vector.extract_strided_slice %228 {offsets = [0, 0], sizes = [2, 16], strides = [1, 1]} : vector<2x32xf32> to vector<2x16xf32>
    %c2_71 = arith.constant 2 : index
    %c0_72 = arith.constant 0 : index
    %230 = vector.load %arg6[%c2_71, %c0_72] : memref<8x32xf32, #tpu.memory_space<vmem>>, vector<2x16xf32>
    tpu.vector_store %arg6[%c2_71, %c0_72], %229 {strides = array<i32>} : memref<8x32xf32, #tpu.memory_space<vmem>>, vector<2x16xf32>,
    %231 = vector.extract_strided_slice %228 {offsets = [0, 16], sizes = [2, 16], strides = [1, 1]} : vector<2x32xf32> to vector<2x16xf32>
    %c4_73 = arith.constant 4 : index
    %c16_74 = arith.constant 16 : index
    %232 = vector.load %arg6[%c4_73, %c16_74] : memref<8x32xf32, #tpu.memory_space<vmem>>, vector<2x16xf32>
    tpu.vector_store %arg6[%c4_73, %c16_74], %231 {strides = array<i32>} : memref<8x32xf32, #tpu.memory_space<vmem>>, vector<2x16xf32>,
    %233 = vector.extract_strided_slice %179 {offsets = [4, 0], sizes = [2, 128], strides = [1, 1]} : vector<8x128xf32> to vector<2x128xf32>
    %234 = vector.extract_strided_slice %180 {offsets = [2, 0], sizes = [2, 128], strides = [1, 1]} : vector<8x128xf32> to vector<2x128xf32>
    %235 = arith.addf %233, %234 : vector<2x128xf32>
    %cst_75 = arith.constant dense<0.000000e+00> : vector<2x128xf32>
    %236 = tpu.matmul %228, %175, %cst_75 {dimension_numbers = #tpu.dot_dimension_numbers<[1], [0], [0], [1], [0, 0, 1, 1], [], []>} : vector<2x32xf32>, vector<32x128xf32>, vector<2x128xf32> -> vector<2x128xf32>
    %237 = arith.addf %235, %236 : vector<2x128xf32>
    %238 = vector.extract_strided_slice %237 {offsets = [0, 0], sizes = [2, 96], strides = [1, 1]} : vector<2x128xf32> to vector<2x96xf32>
    %239 = arith.negf %238 : vector<2x96xf32>
    %240 = math.exp %239 : vector<2x96xf32>
    %cst_76 = arith.constant 1.000000e+00 : f32
    %241 = vector.broadcast %cst_76 : f32 to vector<2x96xf32>
    %242 = arith.addf %241, %240 : vector<2x96xf32>
    %243 = arith.divf %241, %242 : vector<2x96xf32>
    %244 = vector.extract_strided_slice %237 {offsets = [0, 96], sizes = [2, 32], strides = [1, 1]} : vector<2x128xf32> to vector<2x32xf32>
    %245 = math.tanh %244 : vector<2x32xf32>
    %246 = vector.extract_strided_slice %243 {offsets = [0, 32], sizes = [2, 32], strides = [1, 1]} : vector<2x96xf32> to vector<2x32xf32>
    %247 = arith.mulf %246, %225 : vector<2x32xf32>
    %248 = vector.extract_strided_slice %243 {offsets = [0, 0], sizes = [2, 32], strides = [1, 1]} : vector<2x96xf32> to vector<2x32xf32>
    %249 = arith.mulf %248, %245 : vector<2x32xf32>
    %250 = arith.addf %247, %249 : vector<2x32xf32>
    %251 = vector.extract_strided_slice %243 {offsets = [0, 64], sizes = [2, 32], strides = [1, 1]} : vector<2x96xf32> to vector<2x32xf32>
    %252 = math.tanh %250 : vector<2x32xf32>
    %253 = arith.mulf %251, %252 : vector<2x32xf32>
    %254 = vector.extract_strided_slice %253 {offsets = [0, 0], sizes = [2, 16], strides = [1, 1]} : vector<2x32xf32> to vector<2x16xf32>
    %c4_77 = arith.constant 4 : index
    %c0_78 = arith.constant 0 : index
    %255 = vector.load %arg6[%c4_77, %c0_78] : memref<8x32xf32, #tpu.memory_space<vmem>>, vector<2x16xf32>
    tpu.vector_store %arg6[%c4_77, %c0_78], %254 {strides = array<i32>} : memref<8x32xf32, #tpu.memory_space<vmem>>, vector<2x16xf32>,
    %256 = vector.extract_strided_slice %253 {offsets = [0, 16], sizes = [2, 16], strides = [1, 1]} : vector<2x32xf32> to vector<2x16xf32>
    %c2_79 = arith.constant 2 : index
    %c16_80 = arith.constant 16 : index
    %257 = vector.load %arg6[%c2_79, %c16_80] : memref<8x32xf32, #tpu.memory_space<vmem>>, vector<2x16xf32>
    tpu.vector_store %arg6[%c2_79, %c16_80], %256 {strides = array<i32>} : memref<8x32xf32, #tpu.memory_space<vmem>>, vector<2x16xf32>,
    %258 = vector.extract_strided_slice %179 {offsets = [6, 0], sizes = [2, 128], strides = [1, 1]} : vector<8x128xf32> to vector<2x128xf32>
    %259 = vector.extract_strided_slice %180 {offsets = [0, 0], sizes = [2, 128], strides = [1, 1]} : vector<8x128xf32> to vector<2x128xf32>
    %260 = arith.addf %258, %259 : vector<2x128xf32>
    %cst_81 = arith.constant dense<0.000000e+00> : vector<2x128xf32>
    %261 = tpu.matmul %253, %175, %cst_81 {dimension_numbers = #tpu.dot_dimension_numbers<[1], [0], [0], [1], [0, 0, 1, 1], [], []>} : vector<2x32xf32>, vector<32x128xf32>, vector<2x128xf32> -> vector<2x128xf32>
    %262 = arith.addf %260, %261 : vector<2x128xf32>
    %263 = vector.extract_strided_slice %262 {offsets = [0, 0], sizes = [2, 96], strides = [1, 1]} : vector<2x128xf32> to vector<2x96xf32>
    %264 = arith.negf %263 : vector<2x96xf32>
    %265 = math.exp %264 : vector<2x96xf32>
    %cst_82 = arith.constant 1.000000e+00 : f32
    %266 = vector.broadcast %cst_82 : f32 to vector<2x96xf32>
    %267 = arith.addf %266, %265 : vector<2x96xf32>
    %268 = arith.divf %266, %267 : vector<2x96xf32>
    %269 = vector.extract_strided_slice %262 {offsets = [0, 96], sizes = [2, 32], strides = [1, 1]} : vector<2x128xf32> to vector<2x32xf32>
    %270 = math.tanh %269 : vector<2x32xf32>
    %271 = vector.extract_strided_slice %268 {offsets = [0, 32], sizes = [2, 32], strides = [1, 1]} : vector<2x96xf32> to vector<2x32xf32>
    %272 = arith.mulf %271, %250 : vector<2x32xf32>
    %273 = vector.extract_strided_slice %268 {offsets = [0, 0], sizes = [2, 32], strides = [1, 1]} : vector<2x96xf32> to vector<2x32xf32>
    %274 = arith.mulf %273, %270 : vector<2x32xf32>
    %275 = arith.addf %272, %274 : vector<2x32xf32>
    %276 = vector.extract_strided_slice %268 {offsets = [0, 64], sizes = [2, 32], strides = [1, 1]} : vector<2x96xf32> to vector<2x32xf32>
    %277 = math.tanh %275 : vector<2x32xf32>
    %278 = arith.mulf %276, %277 : vector<2x32xf32>
    %279 = vector.extract_strided_slice %278 {offsets = [0, 0], sizes = [2, 16], strides = [1, 1]} : vector<2x32xf32> to vector<2x16xf32>
    %c6_83 = arith.constant 6 : index
    %c0_84 = arith.constant 0 : index
    %280 = vector.load %arg6[%c6_83, %c0_84] : memref<8x32xf32, #tpu.memory_space<vmem>>, vector<2x16xf32>
    tpu.vector_store %arg6[%c6_83, %c0_84], %279 {strides = array<i32>} : memref<8x32xf32, #tpu.memory_space<vmem>>, vector<2x16xf32>,
    %281 = vector.extract_strided_slice %278 {offsets = [0, 16], sizes = [2, 16], strides = [1, 1]} : vector<2x32xf32> to vector<2x16xf32>
    %c0_85 = arith.constant 0 : index
    %c16_86 = arith.constant 16 : index
    %282 = vector.load %arg6[%c0_85, %c16_86] : memref<8x32xf32, #tpu.memory_space<vmem>>, vector<2x16xf32>
    tpu.vector_store %arg6[%c0_85, %c16_86], %281 {strides = array<i32>} : memref<8x32xf32, #tpu.memory_space<vmem>>, vector<2x16xf32>,
    %c0_87 = arith.constant 0 : index
    %c0_88 = arith.constant 0 : index
    %283 = vector.load %arg6[%c0_87, %c0_88] : memref<8x32xf32, #tpu.memory_space<vmem>>, vector<8x32xf32>
    %c194 = arith.constant 194 : index
    %c0_89 = arith.constant 0 : index
    %284 = vector.load %arg3[%c194, %c0_89] : memref<291x128xf32, #tpu.memory_space<vmem>>, vector<32x128xf32>
    %c226 = arith.constant 226 : index
    %c0_90 = arith.constant 0 : index
    %285 = vector.load %arg3[%c226, %c0_90] : memref<291x128xf32, #tpu.memory_space<vmem>>, vector<32x128xf32>
    %c258 = arith.constant 258 : index
    %c0_91 = arith.constant 0 : index
    %286 = vector.load %arg3[%c258, %c0_91] : memref<291x128xf32, #tpu.memory_space<vmem>>, vector<32x128xf32>
    %c290 = arith.constant 290 : index
    %c0_92 = arith.constant 0 : index
    %287 = vector.load %arg3[%c290, %c0_92] : memref<291x128xf32, #tpu.memory_space<vmem>>, vector<1x128xf32>
    %cst_93 = arith.constant dense<0.000000e+00> : vector<8x128xf32>
    %288 = tpu.matmul %283, %284, %cst_93 {dimension_numbers = #tpu.dot_dimension_numbers<[1], [0], [0], [1], [0, 0, 1, 1], [], []>} : vector<8x32xf32>, vector<32x128xf32>, vector<8x128xf32> -> vector<8x128xf32>
    %289 = vector.broadcast %287 : vector<1x128xf32> to vector<8x128xf32>
    %290 = arith.addf %288, %289 : vector<8x128xf32>
    %cst_94 = arith.constant dense<0.000000e+00> : vector<8x128xf32>
    %291 = tpu.matmul %283, %285, %cst_94 {dimension_numbers = #tpu.dot_dimension_numbers<[1], [0], [0], [1], [0, 0, 1, 1], [], []>} : vector<8x32xf32>, vector<32x128xf32>, vector<8x128xf32> -> vector<8x128xf32>
    %cst_95 = arith.constant 0.000000e+00 : f32
    %292 = vector.broadcast %cst_95 : f32 to vector<2x32xf32>
    %cst_96 = arith.constant 0.000000e+00 : f32
    %293 = vector.broadcast %cst_96 : f32 to vector<2x32xf32>
    %294 = vector.extract_strided_slice %290 {offsets = [0, 0], sizes = [2, 128], strides = [1, 1]} : vector<8x128xf32> to vector<2x128xf32>
    %295 = vector.extract_strided_slice %291 {offsets = [6, 0], sizes = [2, 128], strides = [1, 1]} : vector<8x128xf32> to vector<2x128xf32>
    %296 = arith.addf %294, %295 : vector<2x128xf32>
    %cst_97 = arith.constant dense<0.000000e+00> : vector<2x128xf32>
    %297 = tpu.matmul %292, %286, %cst_97 {dimension_numbers = #tpu.dot_dimension_numbers<[1], [0], [0], [1], [0, 0, 1, 1], [], []>} : vector<2x32xf32>, vector<32x128xf32>, vector<2x128xf32> -> vector<2x128xf32>
    %298 = arith.addf %296, %297 : vector<2x128xf32>
    %299 = vector.extract_strided_slice %298 {offsets = [0, 0], sizes = [2, 96], strides = [1, 1]} : vector<2x128xf32> to vector<2x96xf32>
    %300 = arith.negf %299 : vector<2x96xf32>
    %301 = math.exp %300 : vector<2x96xf32>
    %cst_98 = arith.constant 1.000000e+00 : f32
    %302 = vector.broadcast %cst_98 : f32 to vector<2x96xf32>
    %303 = arith.addf %302, %301 : vector<2x96xf32>
    %304 = arith.divf %302, %303 : vector<2x96xf32>
    %305 = vector.extract_strided_slice %298 {offsets = [0, 96], sizes = [2, 32], strides = [1, 1]} : vector<2x128xf32> to vector<2x32xf32>
    %306 = math.tanh %305 : vector<2x32xf32>
    %307 = vector.extract_strided_slice %304 {offsets = [0, 32], sizes = [2, 32], strides = [1, 1]} : vector<2x96xf32> to vector<2x32xf32>
    %308 = arith.mulf %307, %293 : vector<2x32xf32>
    %309 = vector.extract_strided_slice %304 {offsets = [0, 0], sizes = [2, 32], strides = [1, 1]} : vector<2x96xf32> to vector<2x32xf32>
    %310 = arith.mulf %309, %306 : vector<2x32xf32>
    %311 = arith.addf %308, %310 : vector<2x32xf32>
    %312 = vector.extract_strided_slice %304 {offsets = [0, 64], sizes = [2, 32], strides = [1, 1]} : vector<2x96xf32> to vector<2x32xf32>
    %313 = math.tanh %311 : vector<2x32xf32>
    %314 = arith.mulf %312, %313 : vector<2x32xf32>
    %315 = vector.extract_strided_slice %290 {offsets = [2, 0], sizes = [2, 128], strides = [1, 1]} : vector<8x128xf32> to vector<2x128xf32>
    %316 = vector.extract_strided_slice %291 {offsets = [4, 0], sizes = [2, 128], strides = [1, 1]} : vector<8x128xf32> to vector<2x128xf32>
    %317 = arith.addf %315, %316 : vector<2x128xf32>
    %cst_99 = arith.constant dense<0.000000e+00> : vector<2x128xf32>
    %318 = tpu.matmul %314, %286, %cst_99 {dimension_numbers = #tpu.dot_dimension_numbers<[1], [0], [0], [1], [0, 0, 1, 1], [], []>} : vector<2x32xf32>, vector<32x128xf32>, vector<2x128xf32> -> vector<2x128xf32>
    %319 = arith.addf %317, %318 : vector<2x128xf32>
    %320 = vector.extract_strided_slice %319 {offsets = [0, 0], sizes = [2, 96], strides = [1, 1]} : vector<2x128xf32> to vector<2x96xf32>
    %321 = arith.negf %320 : vector<2x96xf32>
    %322 = math.exp %321 : vector<2x96xf32>
    %cst_100 = arith.constant 1.000000e+00 : f32
    %323 = vector.broadcast %cst_100 : f32 to vector<2x96xf32>
    %324 = arith.addf %323, %322 : vector<2x96xf32>
    %325 = arith.divf %323, %324 : vector<2x96xf32>
    %326 = vector.extract_strided_slice %319 {offsets = [0, 96], sizes = [2, 32], strides = [1, 1]} : vector<2x128xf32> to vector<2x32xf32>
    %327 = math.tanh %326 : vector<2x32xf32>
    %328 = vector.extract_strided_slice %325 {offsets = [0, 32], sizes = [2, 32], strides = [1, 1]} : vector<2x96xf32> to vector<2x32xf32>
    %329 = arith.mulf %328, %311 : vector<2x32xf32>
    %330 = vector.extract_strided_slice %325 {offsets = [0, 0], sizes = [2, 32], strides = [1, 1]} : vector<2x96xf32> to vector<2x32xf32>
    %331 = arith.mulf %330, %327 : vector<2x32xf32>
    %332 = arith.addf %329, %331 : vector<2x32xf32>
    %333 = vector.extract_strided_slice %325 {offsets = [0, 64], sizes = [2, 32], strides = [1, 1]} : vector<2x96xf32> to vector<2x32xf32>
    %334 = math.tanh %332 : vector<2x32xf32>
    %335 = arith.mulf %333, %334 : vector<2x32xf32>
    %336 = vector.extract_strided_slice %290 {offsets = [4, 0], sizes = [2, 128], strides = [1, 1]} : vector<8x128xf32> to vector<2x128xf32>
    %337 = vector.extract_strided_slice %291 {offsets = [2, 0], sizes = [2, 128], strides = [1, 1]} : vector<8x128xf32> to vector<2x128xf32>
    %338 = arith.addf %336, %337 : vector<2x128xf32>
    %cst_101 = arith.constant dense<0.000000e+00> : vector<2x128xf32>
    %339 = tpu.matmul %335, %286, %cst_101 {dimension_numbers = #tpu.dot_dimension_numbers<[1], [0], [0], [1], [0, 0, 1, 1], [], []>} : vector<2x32xf32>, vector<32x128xf32>, vector<2x128xf32> -> vector<2x128xf32>
    %340 = arith.addf %338, %339 : vector<2x128xf32>
    %341 = vector.extract_strided_slice %340 {offsets = [0, 0], sizes = [2, 96], strides = [1, 1]} : vector<2x128xf32> to vector<2x96xf32>
    %342 = arith.negf %341 : vector<2x96xf32>
    %343 = math.exp %342 : vector<2x96xf32>
    %cst_102 = arith.constant 1.000000e+00 : f32
    %344 = vector.broadcast %cst_102 : f32 to vector<2x96xf32>
    %345 = arith.addf %344, %343 : vector<2x96xf32>
    %346 = arith.divf %344, %345 : vector<2x96xf32>
    %347 = vector.extract_strided_slice %340 {offsets = [0, 96], sizes = [2, 32], strides = [1, 1]} : vector<2x128xf32> to vector<2x32xf32>
    %348 = math.tanh %347 : vector<2x32xf32>
    %349 = vector.extract_strided_slice %346 {offsets = [0, 32], sizes = [2, 32], strides = [1, 1]} : vector<2x96xf32> to vector<2x32xf32>
    %350 = arith.mulf %349, %332 : vector<2x32xf32>
    %351 = vector.extract_strided_slice %346 {offsets = [0, 0], sizes = [2, 32], strides = [1, 1]} : vector<2x96xf32> to vector<2x32xf32>
    %352 = arith.mulf %351, %348 : vector<2x32xf32>
    %353 = arith.addf %350, %352 : vector<2x32xf32>
    %354 = vector.extract_strided_slice %346 {offsets = [0, 64], sizes = [2, 32], strides = [1, 1]} : vector<2x96xf32> to vector<2x32xf32>
    %355 = math.tanh %353 : vector<2x32xf32>
    %356 = arith.mulf %354, %355 : vector<2x32xf32>
    %357 = vector.extract_strided_slice %290 {offsets = [6, 0], sizes = [2, 128], strides = [1, 1]} : vector<8x128xf32> to vector<2x128xf32>
    %358 = vector.extract_strided_slice %291 {offsets = [0, 0], sizes = [2, 128], strides = [1, 1]} : vector<8x128xf32> to vector<2x128xf32>
    %359 = arith.addf %357, %358 : vector<2x128xf32>
    %cst_103 = arith.constant dense<0.000000e+00> : vector<2x128xf32>
    %360 = tpu.matmul %356, %286, %cst_103 {dimension_numbers = #tpu.dot_dimension_numbers<[1], [0], [0], [1], [0, 0, 1, 1], [], []>} : vector<2x32xf32>, vector<32x128xf32>, vector<2x128xf32> -> vector<2x128xf32>
    %361 = arith.addf %359, %360 : vector<2x128xf32>
    %362 = vector.extract_strided_slice %361 {offsets = [0, 0], sizes = [2, 96], strides = [1, 1]} : vector<2x128xf32> to vector<2x96xf32>
    %363 = arith.negf %362 : vector<2x96xf32>
    %364 = math.exp %363 : vector<2x96xf32>
    %cst_104 = arith.constant 1.000000e+00 : f32
    %365 = vector.broadcast %cst_104 : f32 to vector<2x96xf32>
    %366 = arith.addf %365, %364 : vector<2x96xf32>
    %367 = arith.divf %365, %366 : vector<2x96xf32>
    %368 = vector.extract_strided_slice %361 {offsets = [0, 96], sizes = [2, 32], strides = [1, 1]} : vector<2x128xf32> to vector<2x32xf32>
    %369 = math.tanh %368 : vector<2x32xf32>
    %370 = vector.extract_strided_slice %367 {offsets = [0, 32], sizes = [2, 32], strides = [1, 1]} : vector<2x96xf32> to vector<2x32xf32>
    %371 = arith.mulf %370, %353 : vector<2x32xf32>
    %372 = vector.extract_strided_slice %367 {offsets = [0, 0], sizes = [2, 32], strides = [1, 1]} : vector<2x96xf32> to vector<2x32xf32>
    %373 = arith.mulf %372, %369 : vector<2x32xf32>
    %374 = arith.addf %371, %373 : vector<2x32xf32>
    %375 = vector.extract_strided_slice %367 {offsets = [0, 64], sizes = [2, 32], strides = [1, 1]} : vector<2x96xf32> to vector<2x32xf32>
    %376 = math.tanh %374 : vector<2x32xf32>
    %377 = arith.mulf %375, %376 : vector<2x32xf32>
    %c128 = arith.constant 128 : index
    %c0_105 = arith.constant 0 : index
    %378 = vector.load %arg2[%c128, %c0_105] : memref<230x32xf32, #tpu.memory_space<vmem>>, vector<32x32xf32>
    %cst_106 = arith.constant dense<0.000000e+00> : vector<2x32xf32>
    %379 = tpu.matmul %377, %378, %cst_106 {dimension_numbers = #tpu.dot_dimension_numbers<[1], [0], [0], [1], [0, 0, 1, 1], [], []>} : vector<2x32xf32>, vector<32x32xf32>, vector<2x32xf32> -> vector<2x32xf32>
    %c0_107 = arith.constant 0 : index
    %c0_108 = arith.constant 0 : index
    %380 = vector.load %arg1[%c0_107, %c0_108] : memref<2x3xf32, #tpu.memory_space<vmem>>, vector<2x3xf32>
    %c160 = arith.constant 160 : index
    %c0_109 = arith.constant 0 : index
    %381 = vector.load %arg2[%c160, %c0_109] : memref<230x32xf32, #tpu.memory_space<vmem>>, vector<3x32xf32>
    %cst_110 = arith.constant dense<0.000000e+00> : vector<2x32xf32>
    %382 = tpu.matmul %380, %381, %cst_110 {dimension_numbers = #tpu.dot_dimension_numbers<[1], [0], [0], [1], [0, 0, 1, 1], [], []>} : vector<2x3xf32>, vector<3x32xf32>, vector<2x32xf32> -> vector<2x32xf32>
    %383 = arith.addf %379, %382 : vector<2x32xf32>
    %c163 = arith.constant 163 : index
    %c0_111 = arith.constant 0 : index
    %384 = vector.load %arg2[%c163, %c0_111] : memref<230x32xf32, #tpu.memory_space<vmem>>, vector<1x32xf32>
    %385 = vector.broadcast %384 : vector<1x32xf32> to vector<2x32xf32>
    %386 = arith.addf %383, %385 : vector<2x32xf32>
    %cst_112 = arith.constant 0.000000e+00 : f32
    %387 = vector.broadcast %cst_112 : f32 to vector<2x32xf32>
    %388 = arith.maximumf %386, %387 : vector<2x32xf32>
    %c164 = arith.constant 164 : index
    %c0_113 = arith.constant 0 : index
    %389 = vector.load %arg2[%c164, %c0_113] : memref<230x32xf32, #tpu.memory_space<vmem>>, vector<32x32xf32>
    %cst_114 = arith.constant dense<0.000000e+00> : vector<2x32xf32>
    %390 = tpu.matmul %388, %389, %cst_114 {dimension_numbers = #tpu.dot_dimension_numbers<[1], [0], [0], [1], [0, 0, 1, 1], [], []>} : vector<2x32xf32>, vector<32x32xf32>, vector<2x32xf32> -> vector<2x32xf32>
    %c196 = arith.constant 196 : index
    %c0_115 = arith.constant 0 : index
    %391 = vector.load %arg2[%c196, %c0_115] : memref<230x32xf32, #tpu.memory_space<vmem>>, vector<1x32xf32>
    %392 = vector.broadcast %391 : vector<1x32xf32> to vector<2x32xf32>
    %393 = arith.addf %390, %392 : vector<2x32xf32>
    %cst_116 = arith.constant 0.000000e+00 : f32
    %394 = vector.broadcast %cst_116 : f32 to vector<2x32xf32>
    %395 = arith.maximumf %393, %394 : vector<2x32xf32>
    %c197 = arith.constant 197 : index
    %c0_117 = arith.constant 0 : index
    %396 = vector.load %arg2[%c197, %c0_117] : memref<230x32xf32, #tpu.memory_space<vmem>>, vector<32x32xf32>
    %cst_118 = arith.constant dense<0.000000e+00> : vector<2x32xf32>
    %397 = tpu.matmul %395, %396, %cst_118 {dimension_numbers = #tpu.dot_dimension_numbers<[1], [0], [0], [1], [0, 0, 1, 1], [], []>} : vector<2x32xf32>, vector<32x32xf32>, vector<2x32xf32> -> vector<2x32xf32>
    %c229 = arith.constant 229 : index
    %c0_119 = arith.constant 0 : index
    %398 = vector.load %arg2[%c229, %c0_119] : memref<230x32xf32, #tpu.memory_space<vmem>>, vector<1x32xf32>
    %399 = vector.broadcast %398 : vector<1x32xf32> to vector<2x32xf32>
    %400 = arith.addf %397, %399 : vector<2x32xf32>
    %401 = vector.extract_strided_slice %400 {offsets = [0, 0], sizes = [2, 1], strides = [1, 1]} : vector<2x32xf32> to vector<2x1xf32>
    %402 = arith.negf %401 : vector<2x1xf32>
    %403 = math.exp %402 : vector<2x1xf32>
    %cst_120 = arith.constant 1.000000e+00 : f32
    %404 = vector.broadcast %cst_120 : f32 to vector<2x1xf32>
    %405 = arith.addf %404, %403 : vector<2x1xf32>
    %406 = arith.divf %404, %405 : vector<2x1xf32>
    %c0_121 = arith.constant 0 : index
    %c0_122 = arith.constant 0 : index
    %407 = vector.load %arg4[%c0_121, %c0_122] : memref<2x1xf32, #tpu.memory_space<vmem>>, vector<2x1xf32>
    tpu.vector_store %arg4[%c0_121, %c0_122], %406 {strides = array<i32>} : memref<2x1xf32, #tpu.memory_space<vmem>>, vector<2x1xf32>,
    return
  }
}

</mosaic_0001>

<bundles_post_ra>
// kernel: net_forward.1
= control target key start
LH: loop header
LB: loop body
LE: loop exit
PB: predicated region body
PF: predicated region fallthrough
CT: control target
= control target key end

     0   :  { %vm57_vm0 = vcmask 1043456   ;;  %vm32_vm1 = vcmask 97280   ;;  %vm3627_vm2 = vmmov 1   ;;  %v196_v27 = vlaneseq  ;;  %s3631_s16 = smov 32   ;;  %s3632_s17 = smov 64   ;;  %s4177_s2 = inlined_call_operand.vmem [shape: f32[230,32], index: 2, kind: input, shape index: {}]   ;;  %s4178_s0 = inlined_call_operand.vmem [shape: f32[64,12], index: 0, kind: input, shape index: {}]   ;;  %s4179_s3 = inlined_call_operand.vmem [shape: f32[291,128], index: 3, kind: input, shape index: {}]   ;;  %s4180_s1 = inlined_call_operand.vmem [shape: f32[2,3], index: 1, kind: input, shape index: {}]   ;;  %s4181_s4 = inlined_call_operand.vmem [shape: f32[2,1], index: 4, kind: output, shape index: {}]  }
   0x1   :  { %v25_v0 = vld [vmem:[%s4177_s2] sm:$0xff]  ;;  %v26_v1 = vld [vmem:[%s4177_s2 + $0x8] sm:$0xf]  ;;  %vm3348_vm3 = vmpackc.low %vm57_vm0, %vm3627_vm2  ;;  %vm291_vm4 = vcmask 261120   ;;  %vm3629_vm11 = vmmov 0   ;;  %vm954_vm12 = vcmask 123904  }
   0x2   :  { %v3347_v2 = vpack.c.bf16 %v26_v1, %v25_v0  ;;  %v17_v3 = vld [vmem:[%s4178_s0] sm:$0xff]  ;;  %v18_v5 = vld [vmem:[%s4178_s0 + $0x8] sm:$0xff]  ;;  %v19_v7 = vld [vmem:[%s4178_s0 + $0x10] sm:$0xff]  ;;  %v3720_v42 = vshrl.u32 %v196_v27, 7  ;;  %vm956_vm13 = vcmask 255104   ;;  %vm1068_vm14 = vcmask 125954  }
   0x3   :  { %v21_v4 = vld [vmem:[%s4178_s0 + $0x20] sm:$0xff]  ;;  %3046 = vmatprep.mubr.msk.f32.mxu0 %vm32_vm1, %v17_v3  ;;  %v22_v6 = vld [vmem:[%s4178_s0 + $0x28] sm:$0xff]  ;;  %v23_v8 = vld [vmem:[%s4178_s0 + $0x30] sm:$0xff]  ;;  %vm1070_vm15 = vcmask 257154   ;;  %vm1182_vm0 = vcmask 128004   ;;  %vm1296_vm2 = vcmask 130054  }
   0x4   :  { %3052 = vmatprep.mubr.msk.f32.mxu1 %vm32_vm1, %v21_v4  ;;  %3349 = vmatprep.subr.msk.bf16.mxu0 %vm3348_vm3, %v3347_v2  ;;  %v20_v9 = vld [vmem:[%s4178_s0 + $0x18] sm:$0xff]  ;;  %v287_v11 = vld [vmem:[%s4177_s2 + $0x2f] sm:$0xff]  ;;  %v290_v15 = vld [vmem:[%s4177_s2 + $0x47] sm:$0xff]  ;;  %vm257_vm5 = vcmp.lt.s32.totalorder %v3720_v42, 1  ;;  %v199_v57 = vadd.s32 16, %v3720_v42  ;;  %vm274_vm6 = vcmp.lt.s32.totalorder %v3720_v42, 7 }
   0x5   :  { %3511 = vmatprep.subr.msk.bf16.mxu1 %vm3348_vm3, %v3347_v2  ;;  %3352 = vmatpush3.bf16.msk.msra.mxu0 %vm3348_vm3, %v3347_v2  ;;  %v24_v10 = vld [vmem:[%s4178_s0 + $0x38] sm:$0xff]  ;;  %v283_v17 = vld [vmem:[%s4177_s2 + $0xf] sm:$0xff]  ;;  %v2829_v20 = vld [vmem:[%s4177_s2 + $0xc] ss:$0 sm:$0xff]  ;;  %v205_v63 = vand.u32 15, %v3720_v42 }
   0x6   :  { %3512 = vmatpush3.bf16.msk.msra.mxu1 %vm3348_vm3, %v3347_v2  ;;  %v288_v12 = vld [vmem:[%s4177_s2 + $0x37] sm:$0xff]  ;;  %v289_v14 = vld [vmem:[%s4177_s2 + $0x3f] sm:$0xff]  ;;  %v2839_v32 = vld [vmem:[%s4177_s2 + $0xd] ss:$0 sm:$0xff]  ;;  %vm1298_vm3 = vcmask 261254  }
   0x7   :  { %v3353_v13 = vpack.c.bf16 %v288_v12, %v287_v11  ;;  %v3357_v16 = vpack.c.bf16 %v290_v15, %v289_v14  ;;  %v284_v18 = vld [vmem:[%s4177_s2 + $0x17] sm:$0xff]  ;;  %v2840_v43 = vld [vmem:[%s4177_s2 + $0xe] ss:$0 sm:$0xff]  ;;  %v285_v50 = vld [vmem:[%s4177_s2 + $0x1f] sm:$0xff]  ;;  %vm3747_vm7 = vcmp.eq.s32.totalorder %v205_v63, 0 }
   0x8   :  { %3047 = vmatmul.mubr.msk.f32.vlgmr.msra.gmra.mrb[0].mxu0 %vm32_vm1, %v18_v5  ;;  %v3361_v19 = vpack.c.bf16 %v284_v18, %v283_v17  ;;  %v286_v51 = vld [vmem:[%s4177_s2 + $0x27] sm:$0xff]  ;;  %v486_v3 = vld [vmem:[%s4177_s2 + $0x4f] sm:$0xff]  ;;  %v487_v4 = vld [vmem:[%s4177_s2 + $0x57] sm:$0xff] }
   0x9   :  { %3053 = vmatmul.mubr.msk.f32.vlgmr.msra.gmra.mrb[0].mxu1 %vm32_vm1, %v22_v6  ;;  %3049 = vmatprep.mubr.msk.f32.mxu0 %vm32_vm1, %v19_v7  ;;  %v3365_v60 = vpack.c.bf16 %v286_v51, %v285_v50  ;;  %v219_v7 = vand.u32 15, %v199_v57  ;;  %v488_v17 = vld [vmem:[%s4177_s2 + $0x5f] sm:$0xff]  ;;  %v489_v18 = vld [vmem:[%s4177_s2 + $0x67] sm:$0xff] }
   0xa   :  { %3055 = vmatprep.mubr.msk.f32.mxu1 %vm32_vm1, %v23_v8  ;;  %3354 = vmatprep.subr.bf16.mxu1 %v3353_v13  ;;  %v3373_v27 = vpack.c.bf16 %v489_v18, %v488_v17  ;;  %v605_v57 = vld [vmem:[%s4177_s2 + $0x78] sm:$0xff]  ;;  %v2856_v11 = vld [vmem:[%s4179_s3 + $0x60] ss:$0 sm:$0xff] }
   0xb   :  { %3356 = vmatpush3.bf16.msra.mxu1 %v3353_v13  ;;  %v3369_v13 = vpack.c.bf16 %v487_v4, %v486_v3  ;;  %vm3761_vm8 = vcmp.eq.s32.totalorder %v219_v7, 0  ;;  %v695_v63 = vld [vmem:[%s4179_s3 + $0x38] sm:$0xff]  ;;  %v697_v3 = vld [vmem:[%s4179_s3 + $0x48] sm:$0xff] }
   0xc   :  { %3050 = vmatmul.mubr.msk.f32.gmra.mrb[2].mxu0 %vm32_vm1, %v20_v9  ;;  %3358 = vmatprep.subr.bf16.mxu1 %v3357_v16 }
   0xd   :  { %3056 = vmatmul.mubr.msk.f32.gmra.mrb[2].mxu1 %vm32_vm1, %v24_v10  ;;  %vm1184_vm1 = vcmask 259204  }
   0xf   :  { %3360 = vmatpush3.bf16.msra.mxu1 %v3357_v16 }
  0x10   :  { %3362 = vmatprep.subr.bf16.mxu1 %v3361_v19 }
  0xdb   :  { %v3048_v21 = vpop.f32.mrb[0].mxu0 }
  0xdc   :  { %v3054_v22 = vpop.f32.mrb[0].mxu1  ;;  %v133_v23 = vadd.f32 %v3048_v21, %v2829_v20  ;;  %v127_v25 = vpop.f32.mrb[1].mxu0  ;;  %v198_v21 = vadd.s32 8, %v3720_v42 }
  0xdd   :  { %v153_v24 = vadd.f32 %v3054_v22, %v2829_v20  ;;  %v147_v26 = vpop.f32.mrb[1].mxu1  ;;  %v128_v28 = vadd.f32 %v2829_v20, %v127_v25 }
  0xde   :  { %v148_v29 = vadd.f32 %v2829_v20, %v147_v26  ;;  %v167_v30 = vmax.f32 %v133_v23, 0.0 }
  0xdf   :  { %v171_v31 = vmax.f32 %v153_v24, 0.0  ;;  %v166_v33 = vmax.f32 %v128_v28, 0.0  ;;  %v3051_v35 = vpop.f32.mrb[2].mxu0 }
  0xe0   :  { %v170_v34 = vmax.f32 %v148_v29, 0.0  ;;  %v3057_v36 = vpop.f32.mrb[2].mxu1  ;;  %v143_v38 = vadd.f32 %v3051_v35, %v2829_v20  ;;  %v137_v40 = vpop.f32.mrb[3].mxu0  ;;  %v604_v35 = vld [vmem:[%s4177_s2 + $0x70] sm:$0xff] }
  0xe1   :  { %v175_v37 = vmax.f32 %v167_v30, %v171_v31  ;;  %v163_v39 = vadd.f32 %v3057_v36, %v2829_v20  ;;  %v157_v41 = vpop.f32.mrb[3].mxu1  ;;  %v138_v45 = vadd.f32 %v2829_v20, %v137_v40  ;;  %v212_v30 = vand.u32 15, %v198_v21  ;;  %3108 = vmatprep.mubr.msk.f32.mxu0 %vm291_vm4, %v604_v35  ;;  %v2853_v40 = vld [vmem:[%s4177_s2 + $0x6f] ss:$0 sm:$0xff] }
  0xe2   :  { %v174_v44 = vmax.f32 %v166_v33, %v170_v34  ;;  %v158_v46 = vadd.f32 %v2829_v20, %v157_v41  ;;  %v169_v48 = vmax.f32 %v143_v38, 0.0  ;;  %v200_v31 = vadd.s32 24, %v3720_v42  ;;  %v693_v38 = vld [vmem:[%s4179_s3 + $0x28] sm:$0xff] }
  0xe3   :  { %v184_v47 = vmul.f32 %v2839_v32, %v175_v37  ;;  %v173_v49 = vmax.f32 %v163_v39, 0.0  ;;  %v168_v53 = vmax.f32 %v138_v45, 0.0  ;;  %vm267_vm9 = vcmp.eq.s32.totalorder %v212_v30, 15  ;;  %v692_v37 = vld [vmem:[%s4179_s3 + $0x20] sm:$0xff] }
  0xe4   :  { %v183_v52 = vmul.f32 %v2839_v32, %v174_v44  ;;  %v172_v54 = vmax.f32 %v158_v46, 0.0  ;;  %v3628_v36 = vmov 0.0|0.0   ;;  %v3392_v39 = vpack.c.bf16 %v693_v38, %v692_v37 }
  0xe5   :  { %v193_v55 = vadd.f32 %v2840_v43, %v184_v47  ;;  %v177_v56 = vmax.f32 %v169_v48, %v173_v49 }
  0xe6   :  { %v192_v58 = vadd.f32 %v2840_v43, %v183_v52  ;;  %v176_v59 = vmax.f32 %v168_v53, %v172_v54 }
  0xe7   :  { %v254_v61 = vrot.slane %v193_v55, 7  ;;  %v186_v62 = vmul.f32 %v2839_v32, %v177_v56  ;;  %v271_v0 = vrot.slane %v193_v55, 1  ;;  %v689_v56 = vld [vmem:[%s4179_s3 + $0x8] sm:$0xff] }
  0xe8   :  { %v185_v1 = vmul.f32 %v2839_v32, %v176_v59  ;;  %3066 = vmatprep.mubr.msk.f32.mxu1 %vm291_vm4, %v192_v58  ;;  %v253_v2 = vrot.slane %v192_v58, 7  ;;  %v270_v5 = vrot.slane %v192_v58, 1  ;;  %v226_v32 = vand.u32 15, %v200_v31  ;;  %v690_v59 = vld [vmem:[%s4179_s3 + $0x10] sm:$0xff] }
  0xe9   :  { %v195_v6 = vadd.f32 %v2840_v43, %v186_v62  ;;  %3067 = vmatmul.mubr.msk.f32.vlgmr.msra.gmra.mrb[4].mxu1 %vm291_vm4, %v193_v55  ;;  %v688_v55 = vld [vmem:[%s4179_s3] sm:$0xff]  ;;  %v694_v62 = vld [vmem:[%s4179_s3 + $0x30] sm:$0xff] }
  0xea   :  { %v194_v8 = vadd.f32 %v2840_v43, %v185_v1  ;;  %3364 = vmatpush3.bf16.msra.mxu1 %v3361_v19  ;;  %v260_v9 = vsel %vm257_vm5, %v253_v2, %v254_v61  ;;  %v277_v10 = vsel %vm274_vm6, %v270_v5, %v271_v0  ;;  %vm269_vm10 = vcmp.eq.s32.totalorder %v226_v32, 15 }
  0xeb   :  { %3366 = vmatprep.subr.bf16.mxu1 %v3365_v60  ;;  %v256_v12 = vrot.slane %v195_v6, 7  ;;  %v273_v14 = vrot.slane %v195_v6, 1  ;;  %v3386_v58 = vpack.c.bf16 %v689_v56, %v688_v55  ;;  %v3630_v1 = vmov 0.0  }
  0xec   :  { %v272_v15 = vrot.slane %v194_v8, 1  ;;  %3069 = vmatprep.mubr.msk.f32.mxu1 %vm291_vm4, %v194_v8  ;;  %v255_v16 = vrot.slane %v194_v8, 7  ;;  %v698_v8 = vld [vmem:[%s4179_s3 + $0x50] sm:$0xff] }
  0xed   :  { %3070 = vmatmul.mubr.msk.f32.gmra.mrb[6].mxu1 %vm291_vm4, %v195_v6  ;;  %v261_v19 = vsel %vm257_vm5, %v256_v12, %v253_v2  ;;  %v278_v22 = vsel %vm274_vm6, %v273_v14, %v270_v5  ;;  %v696_v2 = vld [vmem:[%s4179_s3 + $0x40] sm:$0xff] }
  0xee   :  { %3368 = vmatpush3.bf16.msra.mxu1 %v3365_v60  ;;  %v262_v23 = vsel %vm3747_vm7, 0.0, %v261_v19  ;;  %v259_v24 = vsel %vm257_vm5, %v254_v61, %v255_v16  ;;  %v258_v25 = vsel %vm257_vm5, %v255_v16, %v256_v12  ;;  %v276_v26 = vsel %vm274_vm6, %v271_v0, %v272_v15  ;;  %v691_v60 = vld [vmem:[%s4179_s3 + $0x18] sm:$0xff] }
  0xef   :  { %3080 = vmatprep.mubr.msk.f32.mxu1 %vm291_vm4, %v262_v23  ;;  %3370 = vmatprep.subr.bf16.mxu1 %v3369_v13  ;;  %v275_v28 = vsel %vm274_vm6, %v272_v15, %v273_v14  ;;  %v264_v29 = vsel %vm3761_vm8, 0.0, %v259_v24  ;;  %v280_v33 = vsel %vm267_vm9, 0.0, %v276_v26  ;;  %v282_v34 = vsel %vm269_vm10, 0.0, %v278_v22 }
  0xf0   :  { %v3389_v61 = vpack.c.bf16 %v691_v60, %v690_v59  ;;  %v3395_v0 = vpack.c.bf16 %v695_v63, %v694_v62  ;;  %v3840_v6 = vpack.c.bf16 %v697_v3, %v696_v2  ;;  %vm2495_vm5 = vcmask 1042432  }
  0xf1   :  { %3081 = vmatmul.mubr.msk.f32.vlgmr.msra.gmra.mrb[4].mxu1 %vm291_vm4, %v260_v9  ;;  %v699_v9 = vld [vmem:[%s4179_s3 + $0x58] sm:$0xff]  ;;  %vm2491_vm6 = vcmask 23552   ;;  %vm2823_vm7 = vcmask 1024  }
  0xf2   :  { %3083 = vmatprep.mubr.msk.f32.mxu1 %vm291_vm4, %v264_v29  ;;  %3372 = vmatpush3.bf16.msra.mxu1 %v3369_v13 }
  0xf3   :  { %3374 = vmatprep.subr.bf16.mxu1 %v3373_v27 }
  0xf5   :  { %3084 = vmatmul.mubr.msk.f32.gmra.mrb[6].mxu1 %vm291_vm4, %v258_v25 }
  0xf6   :  { %3376 = vmatpush3.bf16.msra.mxu1 %v3373_v27  ;;  %3094 = vmatprep.mubr.msk.f32.mxu1 %vm291_vm4, %v277_v10  ;;  %v3401_v10 = vpack.c.bf16 %v699_v9, %v698_v8 }
  0xf7   :  { %3391 = vmatprep.subr.bf16.mxu1 %v3628_v36 }
  0xf9   :  { %3095 = vmatmul.mubr.msk.f32.vlgmr.msra.gmra.mrb[4].mxu1 %vm291_vm4, %v280_v33 }
  0xfa   :  { %3097 = vmatprep.mubr.msk.f32.mxu1 %vm291_vm4, %v275_v28  ;;  %3393 = vmatpush3.bf16.msra.mxu1 %v3392_v39 }
  0xfb   :  { %3394 = vmatprep.subr.bf16.mxu1 %v3628_v36 }
  0xfd   :  { %3098 = vmatmul.mubr.msk.f32.gmra.mrb[6].mxu1 %vm291_vm4, %v282_v34 }
  0xfe   :  { %3396 = vmatpush3.bf16.msra.mxu1 %v3395_v0  ;;  %3130 = vmatprep.mubr.msk.f32.mxu1 %vm3629_vm11, %v3630_v1 }
  0xff   :  { %3403 = vmatprep.subr.bf16.mxu1 %v3628_v36 }
 0x1cc   :  { %v3096_v41 = vpop.f32.mrb[4].mxu1 }
 0x1cd   :  { %v597_v42 = vadd.f32 %v3096_v41, %v2853_v40  ;;  %v568_v43 = vpop.f32.mrb[5].mxu1 }
 0x1ce   :  { %v596_v44 = vadd.f32 %v2853_v40, %v568_v43 }
 0x1cf   :  { %v601_v45 = vmax.f32 %v597_v42, 0.0 }
 0x1d0   :  { %v600_v46 = vmax.f32 %v596_v44, 0.0  ;;  %v3099_v47 = vpop.f32.mrb[6].mxu1 }
 0x1d1   :  { %v599_v48 = vadd.f32 %v3099_v47, %v2853_v40  ;;  %v578_v49 = vpop.f32.mrb[7].mxu1 }
 0x1d2   :  { %v3377_v50 = vpack.c.bf16 %v601_v45, %v600_v46  ;;  %v598_v51 = vadd.f32 %v2853_v40, %v578_v49 }
 0x1d3   :  { %v603_v52 = vmax.f32 %v599_v48, 0.0 }
 0x1d4   :  { %v602_v53 = vmax.f32 %v598_v51, 0.0  ;;  %3378 = vmatprep.subr.bf16.mxu0 %v3377_v50 }
 0x1d5   :  { %3380 = vmatpush3.bf16.msra.mxu0 %v3377_v50 }
 0x1d6   :  { %v3381_v54 = vpack.c.bf16 %v603_v52, %v602_v53 }
 0x1d8   :  { %3382 = vmatprep.subr.bf16.mxu0 %v3381_v54 }
 0x1d9   :  { %3384 = vmatpush3.bf16.msra.mxu0 %v3381_v54 }
 0x1da   :  { %3385 = vmatprep.subr.bf16.mxu0 %v3628_v36 }
 0x1dc   :  { %3109 = vmatmul.mubr.msk.f32.vlgmr.msra.gmra.mrb[4].mxu0 %vm291_vm4, %v605_v57 }
 0x1dd   :  { %3387 = vmatpush3.bf16.msra.mxu0 %v3386_v58  ;;  %3119 = vmatprep.mubr.msk.f32.mxu0 %vm3629_vm11, %v3630_v1 }
 0x1de   :  { %3388 = vmatprep.subr.bf16.mxu0 %v3628_v36 }
 0x1e1   :  { %3390 = vmatpush3.bf16.msra.mxu0 %v3389_v61 }
 0x1e2   :  { %3397 = vmatprep.subr.bf16.mxu0 %v3628_v36 }
 0x2af   :  { %v3110_v4 = vpop.f32.mrb[4].mxu0 }
 0x2b0   :  { %v678_v5 = vpop.f32.mrb[5].mxu0 }
 0x2b1   :  { %v687_v7 = vmax.f32 %v678_v5, %v3110_v4 }
 0x2b3   :  { %3120 = vmatmul.mubr.msk.f32.vlgmr.msra.gmra.mrb[6].mxu0 %vm291_vm4, %v687_v7  ;;  %3131 = vmatmul.mubr.msk.f32.vlgmr.msra.gmra.mrb[8].mxu1 %vm291_vm4, %v687_v7 }
 0x2b4   :  { %3399 = vmatpush3.bf16.msra.mxu0 %v3840_v6  ;;  %3141 = vmatprep.mubr.msk.f32.mxu0 %vm3629_vm11, %v3630_v1 }
 0x2b5   :  { %3400 = vmatprep.subr.bf16.mxu0 %v3628_v36  ;;  %3405 = vmatpush3.bf16.msra.mxu1 %v3840_v6 }
 0x2b6   :  { %3406 = vmatprep.subr.bf16.mxu1 %v3628_v36  ;;  %3152 = vmatprep.mubr.msk.f32.mxu1 %vm3629_vm11, %v3630_v1 }
 0x2b8   :  { %3402 = vmatpush3.bf16.msra.mxu0 %v3401_v10 }
 0x2b9   :  { %3408 = vmatpush3.bf16.msra.mxu1 %v3401_v10  ;;  %3409 = vmatprep.subr.bf16.mxu0 %v3628_v36 }
 0x2ba   :  { %3415 = vmatprep.subr.bf16.mxu1 %v3628_v36 }
 0x2bb   :  { %3142 = vmatmul.mubr.f32.vlgmr.msra.gmra.mrb[8].mxu0 %v3630_v1 }
 0x2bc   :  { %3411 = vmatpush3.bf16.msra.mxu0 %v3840_v6  ;;  %3163 = vmatprep.mubr.msk.f32.mxu0 %vm3629_vm11, %v3630_v1 }
 0x2bd   :  { %3412 = vmatprep.subr.bf16.mxu0 %v3628_v36 }
 0x2c0   :  { %3414 = vmatpush3.bf16.msra.mxu0 %v3401_v10 }
 0x2c1   :  { %3421 = vmatprep.subr.bf16.mxu0 %v3628_v36 }
 0x386   :  { %v774_v12 = vpop.f32.mrb[6].mxu0  ;;  %v844_v13 = vpop.f32.mrb[8].mxu1 }
 0x387   :  { %v775_v14 = vadd.f32 %v2856_v11, %v774_v12  ;;  %v849_v15 = vrot.slane %v844_v13, 6  ;;  %v958_v16 = vrot.slane %v844_v13, 2  ;;  %v3121_v17 = vpop.f32.mrb[7].mxu0  ;;  %v3132_v18 = vpop.f32.mrb[9].mxu1 }
 0x389   :  { %v3869_v19 = vadd.f32 %v958_v16, %v775_v14  ;;  %v3871_v20 = vadd.f32 %v849_v15, %v775_v14 }
 0x38e   :  { %v921_v21 = vpop.f32.mrb[8].mxu0 }
 0x38f   :  { %v925_v22 = vadd.f32 %v921_v21, %v3871_v20  ;;  %v3143_v23 = vpop.f32.mrb[9].mxu0 }
 0x391   :  { %3527 = vtanh.f32 %v925_v22  ;;  %v2859_v25 = vmul.f32 -1.442695, %v925_v22 }
 0x393   :  { %3529 = vpow2.f32 %v2859_v25 }
 0x39b   :  { %v3528_v24 = vpop.eup %3527 }
 0x39c   :  { %935 = vrot.lane.b32.xlu0 %v3528_v24, %s3631_s16 }
 0x39d   :  { %v3530_v26 = vpop.eup %3529 }
 0x39e   :  { %v929_v27 = vadd.f32 1.0, %v3530_v26 }
 0x3a0   :  { %3531 = vrcp.f32 %v929_v27 }
 0x3aa   :  { %v3532_v28 = vpop.eup %3531 }
 0x3ab   :  { %v933_v31 = vmul.f32 0.0, %v3532_v28 }
 0x40e   :  { %v936_v29 = vpop.permute.xlu0 %935 }
 0x40f   :  { %v938_v30 = vmul.f32 %v3532_v28, %v936_v29 }
 0x411   :  { %940 = vrot.lane.b32.xlu0 %v938_v30, %s3631_s16 }
 0x483   :  { %v941_v32 = vpop.permute.xlu0 %940 }
 0x484   :  { %v943_v33 = vadd.f32 %v941_v32, %v933_v31 }
 0x486   :  { %3533 = vtanh.f32 %v943_v33  ;;  %v1045_v50 = vrot.slane %v943_v33, 6  ;;  %v1301_v33 = vld [vmem:[%s4179_s3 + $0x61] sm:$0xff] }
 0x490   :  { %v3534_v34 = vpop.eup %3533 }
 0x491   :  { %946 = vrot.lane.b32.xlu1 %v3534_v34, %s3631_s16  ;;  %v1302_v34 = vld [vmem:[%s4179_s3 + $0x69] sm:$0xff] }
 0x503   :  { %v947_v35 = vpop.permute.xlu1 %946 }
 0x504   :  { %v949_v37 = vmul.f32 %v3532_v28, %v947_v35  ;;  %v3422_v35 = vpack.c.bf16 %v1302_v34, %v1301_v33 }
 0x506   :  { %951 = vrot.lane.b32.xlu1 %v949_v37, %s3632_s17  ;;  %v1305_v37 = vld [vmem:[%s4179_s3 + $0x81] sm:$0xff] }
 0x578   :  { %v952_v38 = vpop.permute.xlu1 %951 }
 0x579   :  { %955 = vst.msk [vmem:[#allocation2] sm:$0x3] %vm954_vm12, %v952_v38  ;;  %3153 = vmatmul.mubr.msk.f32.vlgmr.msra.gmra.mrb[10].mxu1 %vm291_vm4, %v952_v38 }
 0x57a   :  { %957 = vst.msk [vmem:[#allocation2 + $0x6] sm:$0x3] %vm956_vm13, %v952_v38  ;;  %3417 = vmatpush3.bf16.msra.mxu1 %v3840_v6  ;;  %3174 = vmatprep.mubr.msk.f32.mxu1 %vm3629_vm11, %v3630_v1  ;;  %v1306_v38 = vld [vmem:[%s4179_s3 + $0x89] sm:$0xff] }
 0x57b   :  { %3418 = vmatprep.subr.bf16.mxu1 %v3628_v36 }
 0x57e   :  { %3420 = vmatpush3.bf16.msra.mxu1 %v3401_v10 }
 0x57f   :  { %3427 = vmatprep.subr.bf16.mxu1 %v3628_v36 }
 0x64c   :  { %v1029_v39 = vpop.f32.mrb[10].mxu1 }
 0x64d   :  { %v1034_v40 = vrot.slane %v1029_v39, 6  ;;  %v3154_v41 = vpop.f32.mrb[11].mxu1  ;;  %v3428_v39 = vpack.c.bf16 %v1306_v38, %v1305_v37 }
 0x64e   :  { %v1304_v41 = vld [vmem:[%s4179_s3 + $0x79] sm:$0xff] }
 0x64f   :  { %v1036_v42 = vadd.f32 %v1034_v40, %v3869_v19  ;;  %v1303_v40 = vld [vmem:[%s4179_s3 + $0x71] sm:$0xff] }
 0x651   :  { %3535 = vtanh.f32 %v1036_v42  ;;  %v2861_v44 = vmul.f32 -1.442695, %v1036_v42  ;;  %v1307_v42 = vld [vmem:[%s4179_s3 + $0x91] sm:$0xff] }
 0x653   :  { %3537 = vpow2.f32 %v2861_v44  ;;  %v1308_v44 = vld [vmem:[%s4179_s3 + $0x99] sm:$0xff] }
 0x65b   :  { %v3536_v43 = vpop.eup %3535 }
 0x65c   :  { %1049 = vrot.lane.b32.xlu0 %v3536_v43, %s3631_s16  ;;  %v3425_v43 = vpack.c.bf16 %v1304_v41, %v1303_v40 }
 0x65d   :  { %v3538_v45 = vpop.eup %3537 }
 0x65e   :  { %v1040_v46 = vadd.f32 1.0, %v3538_v45  ;;  %v3431_v45 = vpack.c.bf16 %v1308_v44, %v1307_v42 }
 0x660   :  { %3539 = vrcp.f32 %v1040_v46 }
 0x66a   :  { %v3540_v47 = vpop.eup %3539 }
 0x66b   :  { %v1047_v51 = vmul.f32 %v3540_v47, %v1045_v50  ;;  %v1309_v50 = vld [vmem:[%s4179_s3 + $0xa1] sm:$0xff] }
 0x6ce   :  { %v1050_v48 = vpop.permute.xlu0 %1049 }
 0x6cf   :  { %v1052_v49 = vmul.f32 %v3540_v47, %v1050_v48 }
 0x6d1   :  { %1054 = vrot.lane.b32.xlu1 %v1052_v49, %s3631_s16 }
 0x743   :  { %v1055_v52 = vpop.permute.xlu1 %1054 }
 0x744   :  { %v1057_v53 = vadd.f32 %v1055_v52, %v1047_v51  ;;  %v1310_v51 = vld [vmem:[%s4179_s3 + $0xa9] sm:$0xff] }
 0x745   :  { %v3434_v52 = vpack.c.bf16 %v1310_v51, %v1309_v50 }
 0x746   :  { %3541 = vtanh.f32 %v1057_v53  ;;  %v1159_v7 = vrot.slane %v1057_v53, 6  ;;  %v1311_v53 = vld [vmem:[%s4179_s3 + $0xb1] sm:$0xff] }
 0x750   :  { %v3542_v54 = vpop.eup %3541 }
 0x751   :  { %1060 = vrot.lane.b32.xlu0 %v3542_v54, %s3631_s16  ;;  %v1312_v54 = vld [vmem:[%s4179_s3 + $0xb9] sm:$0xff] }
 0x7c3   :  { %v1061_v55 = vpop.permute.xlu0 %1060 }
 0x7c4   :  { %v1063_v56 = vmul.f32 %v3540_v47, %v1061_v55 }
 0x7c6   :  { %v1072_v57 = vrot.slane %v1063_v56, 2 }
 0x7c8   :  { %1073 = vrot.lane.b32.xlu1 %v1072_v57, %s3632_s17  ;;  %v2866_v57 = vld [vmem:[%s4179_s3 + $0xc1] ss:$0 sm:$0xff] }
 0x83a   :  { %v1074_v58 = vpop.permute.xlu1 %1073 }
 0x83b   :  { %3164 = vmatmul.mubr.msk.f32.vlgmr.msra.gmra.mrb[10].mxu0 %vm291_vm4, %v1074_v58 }
 0x83c   :  { %3185 = vmatprep.mubr.msk.f32.mxu0 %vm3629_vm11, %v3630_v1  ;;  %3423 = vmatpush3.bf16.msra.mxu0 %v3422_v35 }
 0x83d   :  { %3424 = vmatprep.subr.bf16.mxu0 %v3628_v36 }
 0x840   :  { %3426 = vmatpush3.bf16.msra.mxu0 %v3425_v43 }
 0x841   :  { %3433 = vmatprep.subr.bf16.mxu0 %v3628_v36 }
 0x90e   :  { %v1143_v59 = vpop.f32.mrb[10].mxu0 }
 0x90f   :  { %v1148_v60 = vrot.slane %v1143_v59, 4  ;;  %v3165_v61 = vpop.f32.mrb[11].mxu0 }
 0x911   :  { %v1150_v62 = vadd.f32 %v1148_v60, %v3871_v20 }
 0x913   :  { %3543 = vtanh.f32 %v1150_v62  ;;  %v2863_v0 = vmul.f32 -1.442695, %v1150_v62 }
 0x915   :  { %3545 = vpow2.f32 %v2863_v0 }
 0x91d   :  { %v3544_v63 = vpop.eup %3543 }
 0x91e   :  { %1163 = vrot.lane.b32.xlu0 %v3544_v63, %s3631_s16 }
 0x91f   :  { %v3546_v2 = vpop.eup %3545 }
 0x920   :  { %v1154_v3 = vadd.f32 1.0, %v3546_v2 }
 0x922   :  { %3547 = vrcp.f32 %v1154_v3 }
 0x92c   :  { %v3548_v4 = vpop.eup %3547 }
 0x92d   :  { %v1161_v8 = vmul.f32 %v3548_v4, %v1159_v7 }
 0x990   :  { %v1164_v5 = vpop.permute.xlu0 %1163 }
 0x991   :  { %v1166_v6 = vmul.f32 %v3548_v4, %v1164_v5 }
 0x993   :  { %1168 = vrot.lane.b32.xlu1 %v1166_v6, %s3631_s16 }
 0xa05   :  { %v1169_v9 = vpop.permute.xlu1 %1168 }
 0xa06   :  { %v1171_v10 = vadd.f32 %v1169_v9, %v1161_v8 }
 0xa08   :  { %3549 = vtanh.f32 %v1171_v10  ;;  %v1273_v28 = vrot.slane %v1171_v10, 6 }
 0xa12   :  { %v3550_v11 = vpop.eup %3549 }
 0xa13   :  { %1174 = vrot.lane.b32.xlu0 %v3550_v11, %s3631_s16 }
 0xa85   :  { %v1175_v12 = vpop.permute.xlu0 %1174 }
 0xa86   :  { %v1177_v13 = vmul.f32 %v3548_v4, %v1175_v12 }
 0xa88   :  { %v1186_v14 = vrot.slane %v1177_v13, 4 }
 0xa8a   :  { %1187 = vrot.lane.b32.xlu1 %v1186_v14, %s3632_s17 }
 0xafc   :  { %v1188_v15 = vpop.permute.xlu1 %1187 }
 0xafd   :  { %3175 = vmatmul.mubr.msk.f32.vlgmr.msra.gmra.mrb[12].mxu1 %vm291_vm4, %v1188_v15 }
 0xafe   :  { %3196 = vmatprep.mubr.msk.f32.mxu1 %vm3629_vm11, %v3630_v1  ;;  %3429 = vmatpush3.bf16.msra.mxu1 %v3428_v39 }
 0xaff   :  { %3430 = vmatprep.subr.bf16.mxu1 %v3628_v36 }
 0xb02   :  { %3432 = vmatpush3.bf16.msra.mxu1 %v3431_v45 }
 0xb03   :  { %3439 = vmatprep.subr.bf16.mxu1 %v3628_v36 }
 0xbd0   :  { %v1257_v16 = vpop.f32.mrb[12].mxu1 }
 0xbd1   :  { %v1262_v17 = vrot.slane %v1257_v16, 2  ;;  %v3176_v18 = vpop.f32.mrb[13].mxu1 }
 0xbd3   :  { %v1264_v20 = vadd.f32 %v1262_v17, %v3869_v19 }
 0xbd5   :  { %3551 = vtanh.f32 %v1264_v20  ;;  %v2865_v22 = vmul.f32 -1.442695, %v1264_v20 }
 0xbd7   :  { %3553 = vpow2.f32 %v2865_v22 }
 0xbdf   :  { %v3552_v21 = vpop.eup %3551 }
 0xbe0   :  { %1277 = vrot.lane.b32.xlu0 %v3552_v21, %s3631_s16 }
 0xbe1   :  { %v3554_v23 = vpop.eup %3553 }
 0xbe2   :  { %v1268_v24 = vadd.f32 1.0, %v3554_v23 }
 0xbe4   :  { %3555 = vrcp.f32 %v1268_v24 }
 0xbee   :  { %v3556_v25 = vpop.eup %3555 }
 0xbef   :  { %v1275_v29 = vmul.f32 %v3556_v25, %v1273_v28 }
 0xc52   :  { %v1278_v26 = vpop.permute.xlu0 %1277 }
 0xc53   :  { %v1280_v27 = vmul.f32 %v3556_v25, %v1278_v26 }
 0xc55   :  { %1282 = vrot.lane.b32.xlu1 %v1280_v27, %s3631_s16 }
 0xc59   :  { %1065 = vrot.lane.b32.xlu1 %v1063_v56, %s3632_s17  ;;  %v3437_v56 = vpack.c.bf16 %v1312_v54, %v1311_v53 }
 0xcc7   :  { %v1283_v30 = vpop.permute.xlu1 %1282 }
 0xcc8   :  { %v1285_v19 = vadd.f32 %v1283_v30, %v1275_v29 }
 0xcca   :  { %3557 = vtanh.f32 %v1285_v19 }
 0xccb   :  { %v1066_v31 = vpop.permute.xlu1 %1065 }
 0xccc   :  { %1069 = vst.msk [vmem:[#allocation2] sm:$0xc] %vm1068_vm14, %v1066_v31 }
 0xccd   :  { %1071 = vst.msk [vmem:[#allocation2 + $0x2] sm:$0xc] %vm1070_vm15, %v1066_v31 }
 0xcd4   :  { %v3558_v32 = vpop.eup %3557 }
 0xcd5   :  { %1288 = vrot.lane.b32.xlu0 %v3558_v32, %s3631_s16 }
 0xcd9   :  { %1179 = vrot.lane.b32.xlu0 %v1177_v13, %s3632_s17 }
 0xd47   :  { %v1289_v46 = vpop.permute.xlu0 %1288 }
 0xd48   :  { %v1291_v47 = vmul.f32 %v3556_v25, %v1289_v46 }
 0xd4a   :  { %1293 = vrot.lane.b32.xlu1 %v1291_v47, %s3632_s17 }
 0xd4b   :  { %v1180_v48 = vpop.permute.xlu0 %1179 }
 0xd4c   :  { %1183 = vst.msk [vmem:[#allocation2] sm:$0x30] %vm1182_vm0, %v1180_v48 }
 0xd4d   :  { %1185 = vst.msk [vmem:[#allocation2 - $0x2] sm:$0x30] %vm1184_vm1, %v1180_v48 }
 0xdbc   :  { %v1294_v49 = vpop.permute.xlu1 %1293 }
 0xdbd   :  { %1297 = vst.msk [vmem:[#allocation2] sm:$0xc0] %vm1296_vm2, %v1294_v49 }
 0xdbe   :  { %1299 = vst.msk [vmem:[#allocation2 - $0x6] sm:$0xc0] %vm1298_vm3, %v1294_v49 }
 0xdc5   :  { %v1300_v55 = vld [vmem:[#allocation2] sm:$0xff] }
 0xdc6   :  { %3186 = vmatmul.mubr.msk.f32.vlgmr.msra.gmra.mrb[12].mxu0 %vm291_vm4, %v1300_v55  ;;  %3197 = vmatmul.mubr.msk.f32.vlgmr.msra.gmra.mrb[14].mxu1 %vm291_vm4, %v1300_v55 }
 0xdc7   :  { %3435 = vmatpush3.bf16.msra.mxu0 %v3434_v52  ;;  %3207 = vmatprep.mubr.msk.f32.mxu0 %vm3629_vm11, %v3630_v1 }
 0xdc8   :  { %3436 = vmatprep.subr.bf16.mxu0 %v3628_v36  ;;  %3441 = vmatpush3.bf16.msra.mxu1 %v3434_v52 }
 0xdc9   :  { %3442 = vmatprep.subr.bf16.mxu1 %v3628_v36  ;;  %3218 = vmatprep.mubr.msk.f32.mxu1 %vm3629_vm11, %v3630_v1 }
 0xdcb   :  { %3438 = vmatpush3.bf16.msra.mxu0 %v3437_v56 }
 0xdcc   :  { %3444 = vmatpush3.bf16.msra.mxu1 %v3437_v56  ;;  %3445 = vmatprep.subr.bf16.mxu0 %v3628_v36 }
 0xdcd   :  { %3451 = vmatprep.subr.bf16.mxu1 %v3628_v36 }
 0xdce   :  { %3208 = vmatmul.mubr.f32.vlgmr.msra.gmra.mrb[14].mxu0 %v3630_v1 }
 0xdcf   :  { %3447 = vmatpush3.bf16.msra.mxu0 %v3434_v52  ;;  %3229 = vmatprep.mubr.msk.f32.mxu0 %vm3629_vm11, %v3630_v1 }
 0xdd0   :  { %3448 = vmatprep.subr.bf16.mxu0 %v3628_v36 }
 0xdd3   :  { %3450 = vmatpush3.bf16.msra.mxu0 %v3437_v56 }
 0xdd4   :  { %3457 = vmatprep.subr.bf16.mxu0 %v3628_v36 }
 0xe99   :  { %v1387_v58 = vpop.f32.mrb[12].mxu0  ;;  %v1457_v59 = vpop.f32.mrb[14].mxu1 }
 0xe9a   :  { %v1388_v60 = vadd.f32 %v2866_v57, %v1387_v58  ;;  %v1462_v61 = vrot.slane %v1457_v59, 6  ;;  %v1566_v62 = vrot.slane %v1457_v59, 2  ;;  %v3187_v63 = vpop.f32.mrb[13].mxu0  ;;  %v3198_v0 = vpop.f32.mrb[15].mxu1 }
 0xe9c   :  { %v3973_v2 = vadd.f32 %v1566_v62, %v1388_v60  ;;  %v3975_v3 = vadd.f32 %v1462_v61, %v1388_v60 }
 0xea1   :  { %v1531_v4 = vpop.f32.mrb[14].mxu0 }
 0xea2   :  { %v1535_v5 = vadd.f32 %v1531_v4, %v3975_v3  ;;  %v3209_v6 = vpop.f32.mrb[15].mxu0 }
 0xea4   :  { %3559 = vtanh.f32 %v1535_v5  ;;  %v2869_v8 = vmul.f32 -1.442695, %v1535_v5 }
 0xea6   :  { %3561 = vpow2.f32 %v2869_v8 }
 0xeae   :  { %v3560_v7 = vpop.eup %3559 }
 0xeaf   :  { %1545 = vrot.lane.b32.xlu0 %v3560_v7, %s3631_s16 }
 0xeb0   :  { %v3562_v9 = vpop.eup %3561 }
 0xeb1   :  { %v1539_v10 = vadd.f32 1.0, %v3562_v9 }
 0xeb3   :  { %3563 = vrcp.f32 %v1539_v10 }
 0xebd   :  { %v3564_v11 = vpop.eup %3563 }
 0xebe   :  { %v1543_v14 = vmul.f32 0.0, %v3564_v11 }
 0xf21   :  { %v1546_v12 = vpop.permute.xlu0 %1545 }
 0xf22   :  { %v1548_v13 = vmul.f32 %v3564_v11, %v1546_v12 }
 0xf24   :  { %1550 = vrot.lane.b32.xlu1 %v1548_v13, %s3631_s16 }
 0xf96   :  { %v1551_v15 = vpop.permute.xlu1 %1550 }
 0xf97   :  { %v1553_v16 = vadd.f32 %v1551_v15, %v1543_v14 }
 0xf99   :  { %3565 = vtanh.f32 %v1553_v16  ;;  %v1653_v32 = vrot.slane %v1553_v16, 6  ;;  %v1903_v16 = vld [vmem:[%s4179_s3 + $0xc2] sm:$0xff] }
 0xfa3   :  { %v3566_v17 = vpop.eup %3565 }
 0xfa4   :  { %1556 = vrot.lane.b32.xlu0 %v3566_v17, %s3631_s16  ;;  %v1904_v17 = vld [vmem:[%s4179_s3 + $0xca] sm:$0xff] }
0x1016   :  { %v1557_v18 = vpop.permute.xlu0 %1556 }
0x1017   :  { %v1559_v20 = vmul.f32 %v3564_v11, %v1557_v18  ;;  %v3458_v18 = vpack.c.bf16 %v1904_v17, %v1903_v16 }
0x1019   :  { %1561 = vrot.lane.b32.xlu1 %v1559_v20, %s3632_s17  ;;  %v1907_v20 = vld [vmem:[%s4179_s3 + $0xe2] sm:$0xff] }
0x108b   :  { %v1562_v21 = vpop.permute.xlu1 %1561 }
0x108c   :  { %1564 = vst.msk [vmem:[#allocation3] sm:$0x3] %vm954_vm12, %v1562_v21  ;;  %3219 = vmatmul.mubr.msk.f32.vlgmr.msra.gmra.mrb[16].mxu1 %vm291_vm4, %v1562_v21 }
0x108d   :  { %1565 = vst.msk [vmem:[#allocation3 + $0x6] sm:$0x3] %vm956_vm13, %v1562_v21  ;;  %3453 = vmatpush3.bf16.msra.mxu1 %v3434_v52  ;;  %3240 = vmatprep.mubr.msk.f32.mxu1 %vm3629_vm11, %v3630_v1  ;;  %v1908_v21 = vld [vmem:[%s4179_s3 + $0xea] sm:$0xff] }
0x108e   :  { %3454 = vmatprep.subr.bf16.mxu1 %v3628_v36 }
0x1091   :  { %3456 = vmatpush3.bf16.msra.mxu1 %v3437_v56 }
0x1092   :  { %3463 = vmatprep.subr.bf16.mxu1 %v3628_v36 }
0x115f   :  { %v1637_v22 = vpop.f32.mrb[16].mxu1 }
0x1160   :  { %v1642_v23 = vrot.slane %v1637_v22, 6  ;;  %v3220_v24 = vpop.f32.mrb[17].mxu1  ;;  %v3464_v22 = vpack.c.bf16 %v1908_v21, %v1907_v20 }
0x1161   :  { %v1906_v24 = vld [vmem:[%s4179_s3 + $0xda] sm:$0xff] }
0x1162   :  { %v1644_v25 = vadd.f32 %v1642_v23, %v3973_v2  ;;  %v1905_v23 = vld [vmem:[%s4179_s3 + $0xd2] sm:$0xff] }
0x1164   :  { %3567 = vtanh.f32 %v1644_v25  ;;  %v2871_v27 = vmul.f32 -1.442695, %v1644_v25  ;;  %v1909_v25 = vld [vmem:[%s4179_s3 + $0xf2] sm:$0xff] }
0x1166   :  { %3569 = vpow2.f32 %v2871_v27  ;;  %v1910_v27 = vld [vmem:[%s4179_s3 + $0xfa] sm:$0xff] }
0x116e   :  { %v3568_v26 = vpop.eup %3567 }
0x116f   :  { %1657 = vrot.lane.b32.xlu0 %v3568_v26, %s3631_s16  ;;  %v3461_v26 = vpack.c.bf16 %v1906_v24, %v1905_v23 }
0x1170   :  { %v3570_v28 = vpop.eup %3569 }
0x1171   :  { %v1648_v29 = vadd.f32 1.0, %v3570_v28  ;;  %v3467_v28 = vpack.c.bf16 %v1910_v27, %v1909_v25 }
0x1173   :  { %3571 = vrcp.f32 %v1648_v29 }
0x117d   :  { %v3572_v30 = vpop.eup %3571 }
0x117e   :  { %v1655_v33 = vmul.f32 %v3572_v30, %v1653_v32  ;;  %v1911_v32 = vld [vmem:[%s4179_s3 + $0x102] sm:$0xff] }
0x11e1   :  { %v1658_v19 = vpop.permute.xlu0 %1657 }
0x11e2   :  { %v1660_v31 = vmul.f32 %v3572_v30, %v1658_v19 }
0x11e4   :  { %1662 = vrot.lane.b32.xlu1 %v1660_v31, %s3631_s16 }
0x1256   :  { %v1663_v34 = vpop.permute.xlu1 %1662 }
0x1257   :  { %v1665_v35 = vadd.f32 %v1663_v34, %v1655_v33  ;;  %v1912_v33 = vld [vmem:[%s4179_s3 + $0x10a] sm:$0xff] }
0x1258   :  { %v3470_v34 = vpack.c.bf16 %v1912_v33, %v1911_v32 }
0x1259   :  { %3573 = vtanh.f32 %v1665_v35  ;;  %v1765_v53 = vrot.slane %v1665_v35, 6  ;;  %v1913_v35 = vld [vmem:[%s4179_s3 + $0x112] sm:$0xff] }
0x1263   :  { %v3574_v37 = vpop.eup %3573 }
0x1264   :  { %1668 = vrot.lane.b32.xlu0 %v3574_v37, %s3631_s16  ;;  %v1914_v37 = vld [vmem:[%s4179_s3 + $0x11a] sm:$0xff] }
0x12d6   :  { %v1669_v38 = vpop.permute.xlu0 %1668 }
0x12d7   :  { %v1671_v39 = vmul.f32 %v3572_v30, %v1669_v38 }
0x12d9   :  { %v1678_v40 = vrot.slane %v1671_v39, 2 }
0x12db   :  { %1679 = vrot.lane.b32.xlu1 %v1678_v40, %s3632_s17  ;;  %v2876_v40 = vld [vmem:[%s4179_s3 + $0x122] ss:$0 sm:$0xff] }
0x134d   :  { %v1680_v41 = vpop.permute.xlu1 %1679 }
0x134e   :  { %3230 = vmatmul.mubr.msk.f32.vlgmr.msra.gmra.mrb[16].mxu0 %vm291_vm4, %v1680_v41 }
0x134f   :  { %3251 = vmatprep.mubr.msk.f32.mxu0 %vm3629_vm11, %v3630_v1  ;;  %3459 = vmatpush3.bf16.msra.mxu0 %v3458_v18 }
0x1350   :  { %3460 = vmatprep.subr.bf16.mxu0 %v3628_v36 }
0x1353   :  { %3462 = vmatpush3.bf16.msra.mxu0 %v3461_v26 }
0x1354   :  { %3469 = vmatprep.subr.bf16.mxu0 %v3628_v36 }
0x1421   :  { %v1749_v42 = vpop.f32.mrb[16].mxu0 }
0x1422   :  { %v1754_v43 = vrot.slane %v1749_v42, 4  ;;  %v3231_v44 = vpop.f32.mrb[17].mxu0 }
0x1424   :  { %v1756_v45 = vadd.f32 %v1754_v43, %v3975_v3 }
0x1426   :  { %3575 = vtanh.f32 %v1756_v45  ;;  %v2873_v47 = vmul.f32 -1.442695, %v1756_v45 }
0x1428   :  { %3577 = vpow2.f32 %v2873_v47 }
0x1430   :  { %v3576_v46 = vpop.eup %3575 }
0x1431   :  { %1769 = vrot.lane.b32.xlu0 %v3576_v46, %s3631_s16 }
0x1432   :  { %v3578_v48 = vpop.eup %3577 }
0x1433   :  { %v1760_v49 = vadd.f32 1.0, %v3578_v48 }
0x1435   :  { %3579 = vrcp.f32 %v1760_v49 }
0x143f   :  { %v3580_v50 = vpop.eup %3579 }
0x1440   :  { %v1767_v54 = vmul.f32 %v3580_v50, %v1765_v53 }
0x14a3   :  { %v1770_v51 = vpop.permute.xlu0 %1769 }
0x14a4   :  { %v1772_v52 = vmul.f32 %v3580_v50, %v1770_v51 }
0x14a6   :  { %1774 = vrot.lane.b32.xlu1 %v1772_v52, %s3631_s16 }
0x1518   :  { %v1775_v55 = vpop.permute.xlu1 %1774 }
0x1519   :  { %v1777_v56 = vadd.f32 %v1775_v55, %v1767_v54 }
0x151b   :  { %3581 = vtanh.f32 %v1777_v56  ;;  %v1877_v11 = vrot.slane %v1777_v56, 6 }
0x1525   :  { %v3582_v57 = vpop.eup %3581 }
0x1526   :  { %1780 = vrot.lane.b32.xlu0 %v3582_v57, %s3631_s16 }
0x1598   :  { %v1781_v58 = vpop.permute.xlu0 %1780 }
0x1599   :  { %v1783_v59 = vmul.f32 %v3580_v50, %v1781_v58 }
0x159b   :  { %v1790_v60 = vrot.slane %v1783_v59, 4 }
0x159d   :  { %1791 = vrot.lane.b32.xlu1 %v1790_v60, %s3632_s17 }
0x160f   :  { %v1792_v61 = vpop.permute.xlu1 %1791 }
0x1610   :  { %3241 = vmatmul.mubr.msk.f32.vlgmr.msra.gmra.mrb[18].mxu1 %vm291_vm4, %v1792_v61 }
0x1611   :  { %3262 = vmatprep.mubr.msk.f32.mxu1 %vm3629_vm11, %v3630_v1  ;;  %3465 = vmatpush3.bf16.msra.mxu1 %v3464_v22 }
0x1612   :  { %3466 = vmatprep.subr.bf16.mxu1 %v3628_v36 }
0x1615   :  { %3468 = vmatpush3.bf16.msra.mxu1 %v3467_v28 }
0x1616   :  { %3475 = vmatprep.subr.bf16.mxu1 %v3628_v36 }
0x16e3   :  { %v1861_v62 = vpop.f32.mrb[18].mxu1 }
0x16e4   :  { %v1866_v63 = vrot.slane %v1861_v62, 2  ;;  %v3242_v0 = vpop.f32.mrb[19].mxu1 }
0x16e6   :  { %v1868_v3 = vadd.f32 %v1866_v63, %v3973_v2 }
0x16e8   :  { %3583 = vtanh.f32 %v1868_v3  ;;  %v2875_v5 = vmul.f32 -1.442695, %v1868_v3 }
0x16ea   :  { %3585 = vpow2.f32 %v2875_v5 }
0x16f2   :  { %v3584_v4 = vpop.eup %3583 }
0x16f3   :  { %1881 = vrot.lane.b32.xlu0 %v3584_v4, %s3631_s16 }
0x16f4   :  { %v3586_v6 = vpop.eup %3585 }
0x16f5   :  { %v1872_v7 = vadd.f32 1.0, %v3586_v6 }
0x16f7   :  { %3587 = vrcp.f32 %v1872_v7 }
0x1701   :  { %v3588_v8 = vpop.eup %3587 }
0x1702   :  { %v1879_v12 = vmul.f32 %v3588_v8, %v1877_v11 }
0x1765   :  { %v1882_v9 = vpop.permute.xlu0 %1881 }
0x1766   :  { %v1884_v10 = vmul.f32 %v3588_v8, %v1882_v9 }
0x1768   :  { %1886 = vrot.lane.b32.xlu1 %v1884_v10, %s3631_s16 }
0x176c   :  { %1673 = vrot.lane.b32.xlu1 %v1671_v39, %s3632_s17  ;;  %v3473_v39 = vpack.c.bf16 %v1914_v37, %v1913_v35 }
0x17da   :  { %v1887_v13 = vpop.permute.xlu1 %1886 }
0x17db   :  { %v1889_v2 = vadd.f32 %v1887_v13, %v1879_v12 }
0x17dd   :  { %3589 = vtanh.f32 %v1889_v2 }
0x17de   :  { %v1674_v14 = vpop.permute.xlu1 %1673 }
0x17df   :  { %1676 = vst.msk [vmem:[#allocation3] sm:$0xc] %vm1068_vm14, %v1674_v14 }
0x17e0   :  { %1677 = vst.msk [vmem:[#allocation3 + $0x2] sm:$0xc] %vm1070_vm15, %v1674_v14 }
0x17e7   :  { %v3590_v15 = vpop.eup %3589 }
0x17e8   :  { %1892 = vrot.lane.b32.xlu0 %v3590_v15, %s3631_s16 }
0x17ec   :  { %1785 = vrot.lane.b32.xlu0 %v1783_v59, %s3632_s17 }
0x185a   :  { %v1893_v29 = vpop.permute.xlu0 %1892 }
0x185b   :  { %v1895_v30 = vmul.f32 %v3588_v8, %v1893_v29 }
0x185d   :  { %1897 = vrot.lane.b32.xlu1 %v1895_v30, %s3632_s17 }
0x185e   :  { %v1786_v19 = vpop.permute.xlu0 %1785 }
0x185f   :  { %1788 = vst.msk [vmem:[#allocation3] sm:$0x30] %vm1182_vm0, %v1786_v19 }
0x1860   :  { %1789 = vst.msk [vmem:[#allocation3 - $0x2] sm:$0x30] %vm1184_vm1, %v1786_v19 }
0x18cf   :  { %v1898_v31 = vpop.permute.xlu1 %1897 }
0x18d0   :  { %1900 = vst.msk [vmem:[#allocation3] sm:$0xc0] %vm1296_vm2, %v1898_v31 }
0x18d1   :  { %1901 = vst.msk [vmem:[#allocation3 - $0x6] sm:$0xc0] %vm1298_vm3, %v1898_v31 }
0x18d8   :  { %v1902_v38 = vld [vmem:[#allocation3] sm:$0xff] }
0x18d9   :  { %3252 = vmatmul.mubr.msk.f32.vlgmr.msra.gmra.mrb[18].mxu0 %vm291_vm4, %v1902_v38  ;;  %3263 = vmatmul.mubr.msk.f32.vlgmr.msra.gmra.mrb[20].mxu1 %vm291_vm4, %v1902_v38 }
0x18da   :  { %3471 = vmatpush3.bf16.msra.mxu0 %v3470_v34  ;;  %3273 = vmatprep.mubr.msk.f32.mxu0 %vm3629_vm11, %v3630_v1 }
0x18db   :  { %3472 = vmatprep.subr.bf16.mxu0 %v3628_v36  ;;  %3477 = vmatpush3.bf16.msra.mxu1 %v3470_v34 }
0x18dc   :  { %3478 = vmatprep.subr.bf16.mxu1 %v3628_v36  ;;  %3284 = vmatprep.mubr.msk.f32.mxu1 %vm3629_vm11, %v3630_v1 }
0x18de   :  { %3474 = vmatpush3.bf16.msra.mxu0 %v3473_v39 }
0x18df   :  { %3480 = vmatpush3.bf16.msra.mxu1 %v3473_v39  ;;  %3481 = vmatprep.subr.bf16.mxu0 %v3628_v36 }
0x18e0   :  { %3487 = vmatprep.subr.bf16.mxu1 %v3628_v36 }
0x18e1   :  { %3274 = vmatmul.mubr.f32.vlgmr.msra.gmra.mrb[20].mxu0 %v3630_v1 }
0x18e2   :  { %3483 = vmatpush3.bf16.msra.mxu0 %v3470_v34  ;;  %3295 = vmatprep.mubr.msk.f32.mxu0 %vm3629_vm11, %v3630_v1 }
0x18e3   :  { %3484 = vmatprep.subr.bf16.mxu0 %v3628_v36 }
0x18e6   :  { %3486 = vmatpush3.bf16.msra.mxu0 %v3473_v39 }
0x18e7   :  { %3309 = vmatprep.subr.mxu0 %v3630_v1 }
0x19ac   :  { %v1989_v41 = vpop.f32.mrb[18].mxu0  ;;  %v2059_v42 = vpop.f32.mrb[20].mxu1 }
0x19ad   :  { %v1990_v43 = vadd.f32 %v2876_v40, %v1989_v41  ;;  %v2064_v44 = vrot.slane %v2059_v42, 6  ;;  %v2162_v45 = vrot.slane %v2059_v42, 2  ;;  %v3253_v46 = vpop.f32.mrb[19].mxu0  ;;  %v3264_v47 = vpop.f32.mrb[21].mxu1 }
0x19af   :  { %v4076_v48 = vadd.f32 %v2162_v45, %v1990_v43  ;;  %v4078_v49 = vadd.f32 %v2064_v44, %v1990_v43 }
0x19b4   :  { %v2133_v50 = vpop.f32.mrb[20].mxu0 }
0x19b5   :  { %v2137_v51 = vadd.f32 %v2133_v50, %v4078_v49  ;;  %v3275_v52 = vpop.f32.mrb[21].mxu0 }
0x19b7   :  { %3591 = vtanh.f32 %v2137_v51  ;;  %v2879_v54 = vmul.f32 -1.442695, %v2137_v51 }
0x19b9   :  { %3593 = vpow2.f32 %v2879_v54 }
0x19c1   :  { %v3592_v53 = vpop.eup %3591 }
0x19c2   :  { %2147 = vrot.lane.b32.xlu0 %v3592_v53, %s3631_s16 }
0x19c3   :  { %v3594_v55 = vpop.eup %3593 }
0x19c4   :  { %v2141_v56 = vadd.f32 1.0, %v3594_v55 }
0x19c6   :  { %3595 = vrcp.f32 %v2141_v56 }
0x19d0   :  { %v3596_v57 = vpop.eup %3595 }
0x19d1   :  { %v2145_v60 = vmul.f32 0.0, %v3596_v57 }
0x1a34   :  { %v2148_v58 = vpop.permute.xlu0 %2147 }
0x1a35   :  { %v2150_v59 = vmul.f32 %v3596_v57, %v2148_v58 }
0x1a37   :  { %2152 = vrot.lane.b32.xlu1 %v2150_v59, %s3631_s16 }
0x1aa9   :  { %v2153_v61 = vpop.permute.xlu1 %2152 }
0x1aaa   :  { %v2155_v62 = vadd.f32 %v2153_v61, %v2145_v60  ;;  %v2485_v61 = vld [vmem:[%s4177_s2 + $0x80] sm:$0xff] }
0x1aac   :  { %3597 = vtanh.f32 %v2155_v62  ;;  %v2252_v15 = vrot.slane %v2155_v62, 6  ;;  %v2486_v62 = vld [vmem:[%s4177_s2 + $0x88] sm:$0xff] }
0x1ab6   :  { %v3598_v63 = vpop.eup %3597 }
0x1ab7   :  { %2158 = vrot.lane.b32.xlu0 %v3598_v63, %s3631_s16  ;;  %v2489_v63 = vld [vmem:[%s4180_s1] sm:$0x3] }
0x1b29   :  { %v2159_v0 = vpop.permute.xlu0 %2158 }
0x1b2a   :  { %v2161_v3 = vmul.f32 %v3596_v57, %v2159_v0  ;;  %v3494_v0 = vpack.c.bf16 %v2486_v62, %v2485_v61 }
0x1b2c   :  { %2166 = vrot.lane.b32.xlu1 %v2161_v3, %s3632_s17  ;;  %v2487_v3 = vld [vmem:[%s4177_s2 + $0x90] sm:$0xff] }
0x1b9e   :  { %v2167_v4 = vpop.permute.xlu1 %2166 }
0x1b9f   :  { %3285 = vmatmul.mubr.msk.f32.vlgmr.msra.gmra.mrb[22].mxu1 %vm291_vm4, %v2167_v4  ;;  %v2488_v4 = vld [vmem:[%s4177_s2 + $0x98] sm:$0xff] }
0x1ba0   :  { %3489 = vmatpush3.bf16.msra.mxu1 %v3470_v34  ;;  %3306 = vmatprep.mubr.msk.f32.mxu1 %vm3629_vm11, %v3630_v1 }
0x1ba1   :  { %3490 = vmatprep.subr.bf16.mxu1 %v3628_v36 }
0x1ba4   :  { %3492 = vmatpush3.bf16.msra.mxu1 %v3473_v39 }
0x1ba5   :  { %3499 = vmatprep.subr.bf16.mxu1 %v3628_v36 }
0x1c72   :  { %v2236_v5 = vpop.f32.mrb[22].mxu1 }
0x1c73   :  { %v2241_v6 = vrot.slane %v2236_v5, 6  ;;  %v3286_v7 = vpop.f32.mrb[23].mxu1  ;;  %v3497_v5 = vpack.c.bf16 %v2488_v4, %v2487_v3 }
0x1c75   :  { %v2243_v8 = vadd.f32 %v2241_v6, %v4076_v48 }
0x1c77   :  { %3599 = vtanh.f32 %v2243_v8  ;;  %v2881_v10 = vmul.f32 -1.442695, %v2243_v8 }
0x1c79   :  { %3601 = vpow2.f32 %v2881_v10 }
0x1c81   :  { %v3600_v9 = vpop.eup %3599 }
0x1c82   :  { %2256 = vrot.lane.b32.xlu0 %v3600_v9, %s3631_s16 }
0x1c83   :  { %v3602_v11 = vpop.eup %3601 }
0x1c84   :  { %v2247_v12 = vadd.f32 1.0, %v3602_v11 }
0x1c86   :  { %3603 = vrcp.f32 %v2247_v12 }
0x1c90   :  { %v3604_v13 = vpop.eup %3603 }
0x1c91   :  { %v2254_v16 = vmul.f32 %v3604_v13, %v2252_v15  ;;  %v2654_v15 = vld [vmem:[%s4177_s2 + $0xb4] sm:$0xff] }
0x1cf4   :  { %v2257_v2 = vpop.permute.xlu0 %2256 }
0x1cf5   :  { %v2259_v14 = vmul.f32 %v3604_v13, %v2257_v2  ;;  %v2653_v2 = vld [vmem:[%s4177_s2 + $0xac] sm:$0xff] }
0x1cf7   :  { %2261 = vrot.lane.b32.xlu1 %v2259_v14, %s3631_s16 }
0x1d69   :  { %v2262_v17 = vpop.permute.xlu1 %2261 }
0x1d6a   :  { %v2264_v18 = vadd.f32 %v2262_v17, %v2254_v16  ;;  %v2735_v17 = vld [vmem:[%s4177_s2 + $0xc5] sm:$0xff] }
0x1d6c   :  { %3605 = vtanh.f32 %v2264_v18  ;;  %v2359_v35 = vrot.slane %v2264_v18, 6  ;;  %v2736_v18 = vld [vmem:[%s4177_s2 + $0xcd] sm:$0xff] }
0x1d76   :  { %v3606_v20 = vpop.eup %3605 }
0x1d77   :  { %2267 = vrot.lane.b32.xlu0 %v3606_v20, %s3631_s16  ;;  %v3506_v20 = vpack.c.bf16 %v2736_v18, %v2735_v17 }
0x1de9   :  { %v2268_v21 = vpop.permute.xlu0 %2267 }
0x1dea   :  { %v2270_v22 = vmul.f32 %v3604_v13, %v2268_v21  ;;  %v2652_v13 = vld [vmem:[%s4177_s2 + $0xa4] sm:$0xff] }
0x1deb   :  { %v3500_v14 = vpack.c.bf16 %v2653_v2, %v2652_v13 }
0x1dec   :  { %v2272_v23 = vrot.slane %v2270_v22, 2  ;;  %v2889_v22 = vld [vmem:[%s4177_s2 + $0xa3] ss:$0 sm:$0xff] }
0x1dee   :  { %2273 = vrot.lane.b32.xlu1 %v2272_v23, %s3632_s17 }
0x1e60   :  { %v2274_v24 = vpop.permute.xlu1 %2273 }
0x1e61   :  { %3296 = vmatmul.mubr.msk.f32.vlgmr.msra.gmra.mrb[22].mxu0 %vm291_vm4, %v2274_v24 }
0x1e62   :  { %3311 = vmatprep.mubr.msk.f32.mxu0 %vm3629_vm11, %v3630_v1 }
0x1f34   :  { %v2343_v25 = vpop.f32.mrb[22].mxu0 }
0x1f35   :  { %v2348_v26 = vrot.slane %v2343_v25, 4  ;;  %v3297_v27 = vpop.f32.mrb[23].mxu0 }
0x1f36   :  { %v2737_v27 = vld [vmem:[%s4177_s2 + $0xd5] sm:$0xff] }
0x1f37   :  { %v2350_v28 = vadd.f32 %v2348_v26, %v4078_v49 }
0x1f39   :  { %3607 = vtanh.f32 %v2350_v28  ;;  %v2883_v30 = vmul.f32 -1.442695, %v2350_v28  ;;  %v2738_v28 = vld [vmem:[%s4177_s2 + $0xdd] sm:$0xff] }
0x1f3b   :  { %3609 = vpow2.f32 %v2883_v30 }
0x1f43   :  { %v3608_v29 = vpop.eup %3607 }
0x1f44   :  { %2363 = vrot.lane.b32.xlu0 %v3608_v29, %s3631_s16  ;;  %v2890_v29 = vld [vmem:[%s4177_s2 + $0xc4] ss:$0 sm:$0xff] }
0x1f45   :  { %v3610_v19 = vpop.eup %3609 }
0x1f46   :  { %v2354_v31 = vadd.f32 1.0, %v3610_v19 }
0x1f48   :  { %3611 = vrcp.f32 %v2354_v31 }
0x1f52   :  { %v3612_v32 = vpop.eup %3611 }
0x1f53   :  { %v2361_v37 = vmul.f32 %v3612_v32, %v2359_v35 }
0x1fb6   :  { %v2364_v33 = vpop.permute.xlu0 %2363 }
0x1fb7   :  { %v2366_v34 = vmul.f32 %v3612_v32, %v2364_v33  ;;  %v2892_v33 = vld [vmem:[%s4177_s2 + $0xe5] ss:$0 sm:$0xff] }
0x1fb9   :  { %2368 = vrot.lane.b32.xlu1 %v2366_v34, %s3631_s16 }
0x202b   :  { %v2369_v38 = vpop.permute.xlu1 %2368 }
0x202c   :  { %v2371_v39 = vadd.f32 %v2369_v38, %v2361_v37 }
0x202e   :  { %3613 = vtanh.f32 %v2371_v39  ;;  %v2466_v57 = vrot.slane %v2371_v39, 6 }
0x2038   :  { %v3614_v40 = vpop.eup %3613 }
0x2039   :  { %2374 = vrot.lane.b32.xlu0 %v3614_v40, %s3631_s16 }
0x20ab   :  { %v2375_v41 = vpop.permute.xlu0 %2374 }
0x20ac   :  { %v2377_v42 = vmul.f32 %v3612_v32, %v2375_v41 }
0x20ae   :  { %v2379_v43 = vrot.slane %v2377_v42, 4 }
0x20b0   :  { %2380 = vrot.lane.b32.xlu1 %v2379_v43, %s3632_s17 }
0x2122   :  { %v2381_v44 = vpop.permute.xlu1 %2380 }
0x2123   :  { %3307 = vmatmul.mubr.msk.f32.vlgmr.msra.gmra.mrb[24].mxu1 %vm291_vm4, %v2381_v44 }
0x2124   :  { %3333 = vmatprep.mubr.msk.f32.mxu1 %vm3629_vm11, %v3630_v1  ;;  %3501 = vmatpush3.bf16.msra.mxu1 %v3500_v14 }
0x2125   :  { %3502 = vmatprep.subr.bf16.mxu1 %v3628_v36 }
0x21f6   :  { %v2450_v45 = vpop.f32.mrb[24].mxu1 }
0x21f7   :  { %v2455_v46 = vrot.slane %v2450_v45, 2  ;;  %v3308_v47 = vpop.f32.mrb[25].mxu1 }
0x21f9   :  { %v2457_v49 = vadd.f32 %v2455_v46, %v4076_v48  ;;  %v2490_v48 = vld [vmem:[%s4177_s2 + $0xa0] sm:$0x7] }
0x21fa   :  { %3310 = vmatpush3.msk.msra.mxu0 %vm2495_vm5, %v2490_v48 }
0x21fb   :  { %3615 = vtanh.f32 %v2457_v49  ;;  %v2885_v51 = vmul.f32 -1.442695, %v2457_v49  ;;  %3493 = vmatprep.subr.bf16.mxu0 %v3628_v36  ;;  %3312 = vmatmul.mubr.msk.f32.vlgmr.msra.gmra.mrb[24].mxu0 %vm2491_vm6, %v2489_v63 }
0x21fc   :  { %3495 = vmatpush3.bf16.msra.mxu0 %v3494_v0  ;;  %3322 = vmatprep.mubr.msk.f32.mxu0 %vm3629_vm11, %v3630_v1 }
0x21fd   :  { %3617 = vpow2.f32 %v2885_v51  ;;  %3496 = vmatprep.subr.bf16.mxu0 %v3628_v36 }
0x2200   :  { %3498 = vmatpush3.bf16.msra.mxu0 %v3497_v5 }
0x2201   :  { %3505 = vmatprep.subr.bf16.mxu0 %v3628_v36 }
0x2205   :  { %v3616_v50 = vpop.eup %3615 }
0x2206   :  { %2470 = vrot.lane.b32.xlu0 %v3616_v50, %s3631_s16 }
0x2207   :  { %v3618_v52 = vpop.eup %3617 }
0x2208   :  { %v2461_v53 = vadd.f32 1.0, %v3618_v52 }
0x220a   :  { %3619 = vrcp.f32 %v2461_v53 }
0x2214   :  { %v3620_v54 = vpop.eup %3619 }
0x2215   :  { %v2468_v58 = vmul.f32 %v3620_v54, %v2466_v57 }
0x2278   :  { %v2471_v55 = vpop.permute.xlu0 %2470 }
0x2279   :  { %v2473_v56 = vmul.f32 %v3620_v54, %v2471_v55 }
0x227b   :  { %2475 = vrot.lane.b32.xlu1 %v2473_v56, %s3631_s16 }
0x22ce   :  { %v2565_v10 = vpop.f32.mrb[24].mxu0 }
0x22cf   :  { %v3313_v11 = vpop.f32.mrb[25].mxu0 }
0x22ed   :  { %v2476_v59 = vpop.permute.xlu1 %2475 }
0x22ee   :  { %v2478_v60 = vadd.f32 %v2476_v59, %v2468_v58 }
0x22f0   :  { %3621 = vtanh.f32 %v2478_v60 }
0x22fa   :  { %v3622_v6 = vpop.eup %3621 }
0x22fb   :  { %2481 = vrot.lane.b32.xlu0 %v3622_v6, %s3631_s16 }
0x236d   :  { %v2482_v7 = vpop.permute.xlu0 %2481 }
0x236e   :  { %v2484_v8 = vmul.f32 %v3620_v54, %v2482_v7 }
0x2370   :  { %v2570_v9 = vrot.slane %v2484_v8, 6 }
0x2372   :  { %2571 = vrot.lane.b32.xlu1 %v2570_v9, %s3632_s17 }
0x23e4   :  { %v2572_v12 = vpop.permute.xlu1 %2571 }
0x23e5   :  { %3323 = vmatmul.mubr.msk.f32.vlgmr.msra.gmra.mrb[26].mxu0 %vm291_vm4, %v2572_v12 }
0x23e6   :  { %3344 = vmatprep.mubr.msk.f32.mxu0 %vm3629_vm11, %v3630_v1  ;;  %v2655_v1 = vld [vmem:[%s4177_s2 + $0xbc] sm:$0xff]  ;;  %3507 = vmatpush3.bf16.msra.mxu0 %v3506_v20 }
0x23e7   :  { %v3503_v16 = vpack.c.bf16 %v2655_v1, %v2654_v15  ;;  %3508 = vmatprep.subr.bf16.mxu0 %v3628_v36  ;;  %v3509_v36 = vpack.c.bf16 %v2738_v28, %v2737_v27 }
0x23e9   :  { %3504 = vmatpush3.bf16.msra.mxu1 %v3503_v16 }
0x23ea   :  { %3510 = vmatpush3.bf16.msra.mxu0 %v3509_v36 }
0x24b8   :  { %v2641_v21 = vpop.f32.mrb[26].mxu0 }
0x24b9   :  { %v2642_v23 = vadd.f32 %v2641_v21, %v2565_v10  ;;  %v3324_v24 = vpop.f32.mrb[27].mxu0 }
0x24bb   :  { %v2650_v25 = vadd.f32 %v2889_v22, %v2642_v23 }
0x24bd   :  { %v2651_v26 = vmax.f32 %v2650_v25, 0.0 }
0x24bf   :  { %3334 = vmatmul.mubr.msk.f32.vlgmr.msra.gmra.mrb[26].mxu1 %vm291_vm4, %v2651_v26 }
0x2592   :  { %v2730_v30 = vpop.f32.mrb[26].mxu1 }
0x2593   :  { %v2731_v19 = vadd.f32 %v2890_v29, %v2730_v30  ;;  %v3335_v31 = vpop.f32.mrb[27].mxu1 }
0x2595   :  { %v2734_v32 = vmax.f32 %v2731_v19, 0.0 }
0x2597   :  { %3345 = vmatmul.mubr.msk.f32.vlgmr.msra.gmra.mrb[28].mxu0 %vm291_vm4, %v2734_v32 }
0x266a   :  { %v2813_v34 = vpop.f32.mrb[28].mxu0 }
0x266b   :  { %v2814_v35 = vadd.f32 %v2892_v33, %v2813_v34  ;;  %v3346_v37 = vpop.f32.mrb[29].mxu0 }
0x266d   :  { %v2894_v38 = vmul.f32 -1.442695, %v2814_v35 }
0x266f   :  { %3623 = vpow2.f32 %v2894_v38 }
0x2679   :  { %v3624_v39 = vpop.eup %3623 }
0x267a   :  { %v2820_v40 = vadd.f32 1.0, %v3624_v39 }
0x267c   :  { %3625 = vrcp.f32 %v2820_v40 }
0x2686   :  { %v3626_v41 = vpop.eup %3625 }
0x2687   :  { %2824 = vst.msk [vmem:[%s4181_s4] sm:$0x3] %vm2823_vm7, %v3626_v41 }

</bundles_post_ra>
